<compile_context>
chip_gen: v5e
topology: v5e:2x2
jax: 0.10.0
libtpu: 0.0.40
codegen_flags: <defaults>
</compile_context>

<pallas_src>
import jax
import jax.numpy as jnp
from jax.experimental import pallas as pl
from jax.experimental.pallas import tpu as pltpu


def _yolo_loss_kernel(pred_t_ref, targ_t_ref, targ_b_ref, out_ref):
    TB = pred_t_ref.shape[0]     # images per grid step
    Cc = pred_t_ref.shape[1]     # 30 channels
    N = pred_t_ref.shape[2]      # S*S cells

    # Hoisted iotas (JAX does not CSE broadcast_in_dim -> build once per step).
    lane_nn = jax.lax.broadcasted_iota(jnp.int32, (N, N), 1)           # pred idx n
    out_lane = jax.lax.broadcasted_iota(jnp.int32, (1, 128), 1)        # output lanes
    row_tb = jax.lax.broadcasted_iota(jnp.int32, (TB, 128), 0)         # output rows
    ch_is_class = jax.lax.broadcasted_iota(jnp.int32, (Cc, N), 0) >= 10

    def per_image(b, acc):
        pt = pred_t_ref[b]       # (30, N) predictions, transposed (lane-dense)
        tt = targ_t_ref[b]       # (30, N) targets, transposed (lane-dense)
        tcols = targ_b_ref[b]    # (N, 5)  target boxes, natural orientation

        # lane-dense (1, N) rows of box params
        px = pt[0:1, :]; py = pt[1:2, :]
        pw = pt[2:3, :]; ph = pt[3:4, :]; pc = pt[4:5, :]
        tx = tt[0:1, :]; ty = tt[1:2, :]
        tw = tt[2:3, :]; th = tt[3:4, :]; tc = tt[4:5, :]

        # (N, 1) columns of the target box params (sublane side of the IoU bcast)
        txc = tcols[:, 0:1]; tyc = tcols[:, 1:2]
        twc = tcols[:, 2:3]; thc = tcols[:, 3:4]; tcc = tcols[:, 4:5]

        # ---- IoU[m, n]: target box of cell m (sublanes) vs pred box n (lanes)
        dx = jnp.abs(txc - px)
        dy = jnp.abs(tyc - py)
        si_w = (twc + pw) * 0.5 - dx
        si_h = (thc + ph) * 0.5 - dy
        s_inter = jnp.maximum(si_w * si_h, 0.0)
        s_union = twc * thc + pw * ph - s_inter
        # Exact division on purpose: iou only feeds the argmax below and an
        # approximate (EUP) reciprocal can flip near-tie argmax selections.
        iou = s_inter / s_union                                    # (N, N)

        # ---- argmax over pred boxes (lanes), first index on ties (torch.max)
        max_iou = jnp.max(iou, axis=1, keepdims=True)              # (N, 1)
        cand = jnp.where(iou == max_iou, lane_nn, N)
        max_sort = jnp.min(cand, axis=1, keepdims=True)            # (N, 1) int32

        # ---- cnt[n] = #object cells whose best-IoU pred box is n -> (1, N) row
        objm_col = tcc > 0.0                                       # (N, 1)
        match = (max_sort == lane_nn) & objm_col                   # (N, N)
        cnt = jnp.sum(jnp.where(match, 1.0, 0.0), axis=0, keepdims=True)

        # ---- localization losses, gathered via cnt weighting (lane-dense rows)
        d_xy = (px - tx) ** 2 + (py - ty) ** 2                     # (1, N)
        # sqrt of raw predicted w/h, exactly like the PyTorch module (would NaN
        # on negative predictions there too; test data is strictly positive).
        d_wh = (jnp.sqrt(pw) - jnp.sqrt(tw)) ** 2 + (jnp.sqrt(ph) - jnp.sqrt(th)) ** 2
        xy_i = jnp.sum(cnt * d_xy, axis=1, keepdims=True)          # (1, 1)
        wh_i = jnp.sum(cnt * d_wh, axis=1, keepdims=True)          # (1, 1)

        # ---- no-object confidence: pred boxes never selected by any object cell
        nocon_i = jnp.sum(jnp.where(cnt > 0.0, 0.0, pc * pc),
                          axis=1, keepdims=True)                   # (1, 1)

        # ---- object confidence + class losses over object cells
        objm_row = tc > 0.0                                        # (1, N)
        conobj_i = jnp.sum(jnp.where(objm_row, (pc - tc) ** 2, 0.0),
                           axis=1, keepdims=True)                  # (1, 1)
        # Class loss: mask channels >= 10 instead of slicing at sublane offset
        # 10 (avoids a relayout; the extra masked rows are negligible).
        diff2 = (pt - tt) ** 2                                     # (30, N)
        cls_sq = jnp.where(ch_is_class & objm_row, diff2, 0.0)     # (30, N)
        cls_i = jnp.sum(jnp.sum(cls_sq, axis=1, keepdims=True),
                        axis=0, keepdims=True)                     # (1, 1)

        # ---- pack the five partial sums into lanes 0..4 of this image's row
        res = (jnp.where(out_lane == 0, xy_i, 0.0)
               + jnp.where(out_lane == 1, wh_i, 0.0)
               + jnp.where(out_lane == 2, nocon_i, 0.0)
               + jnp.where(out_lane == 3, conobj_i, 0.0)
               + jnp.where(out_lane == 4, cls_i, 0.0))             # (1, 128)
        return acc + jnp.where(row_tb == b, res, 0.0)              # (TB, 128)

    acc = jax.lax.fori_loop(0, TB, per_image, jnp.zeros((TB, 128), jnp.float32))
    out_ref[0] = acc


def yolo_loss(pred, target, lambda_coord, lambda_noobj, *, images_per_block=16):
    """pred, target: [B, S, S, 30] float — matches PyTorch Loss.forward."""
    B, S, S2, C = pred.shape
    assert S == S2 and C == 30
    N = S * S

    # TB images per grid step amortize the ~0.35us per-step overhead; keep at
    # least 2 grid steps when B >= 2 so both v7x TensorCores get work.
    # TB <= 16 keeps double-buffered blocks far under v5e's 16 MiB scoped-VMEM
    # default, so no vmem_limit_bytes override is needed.
    tb = max(1, min(images_per_block, (B + 1) // 2))
    G = -(-B // tb)
    B_pad = G * tb

    pred_f = pred.reshape(B, N, C).astype(jnp.float32)
    targ_f = target.reshape(B, N, C).astype(jnp.float32)
    if B_pad != B:
        pad = ((0, B_pad - B), (0, 0), (0, 0))
        pred_f = jnp.pad(pred_f, pad)     # zero-padded images give zero partials
        targ_f = jnp.pad(targ_f, pad)

    pred_t = jnp.transpose(pred_f, (0, 2, 1))       # (B_pad, 30, N)
    targ_t = jnp.transpose(targ_f, (0, 2, 1))       # (B_pad, 30, N)
    targ_b = targ_f[:, :, :5]                       # (B_pad, N, 5)

    partials = pl.pallas_call(
        _yolo_loss_kernel,
        out_shape=jax.ShapeDtypeStruct((G, tb, 128), jnp.float32),
        grid=(G,),
        in_specs=[
            pl.BlockSpec((tb, C, N), lambda g: (g, 0, 0)),
            pl.BlockSpec((tb, C, N), lambda g: (g, 0, 0)),
            pl.BlockSpec((tb, N, 5), lambda g: (g, 0, 0)),
        ],
        out_specs=pl.BlockSpec((1, tb, 128), lambda g: (g, 0, 0)),
        compiler_params=pltpu.CompilerParams(dimension_semantics=("parallel",)),
    )(pred_t, targ_t, targ_b)

    per_img = partials.reshape(B_pad, 128)[:B]      # drop zero-padded images
    xy = jnp.sum(per_img[:, 0])
    wh = jnp.sum(per_img[:, 1])
    nocon = jnp.sum(per_img[:, 2])
    conobj = jnp.sum(per_img[:, 3])
    cls = jnp.sum(per_img[:, 4])
    return (lambda_coord * (xy + wh) + conobj
            + lambda_noobj * nocon + cls) / B


def ref_loss(pred, target, lc, ln):
    """Pure-JAX reference mirroring the PyTorch forward (for verification)."""
    B, S, _, C = pred.shape
    N = S * S
    pred = pred.reshape(B, N, C)
    target = target.reshape(B, N, C)
    total_xy = total_wh = total_nocon = 0.0
    for i in range(B):
        p, t = pred[i], target[i]
        obj = t[:, 4] > 0
        bp, bt = p[:, :5], t[:, :5]
        dxy = jnp.abs(bt[None, :, :2] - bp[:, None, :2])
        swh = bt[None, :, 2:4] + bp[:, None, 2:4]
        si = swh / 2 - dxy
        s_inter = jnp.maximum(si[..., 0] * si[..., 1], 0.0)
        s_union = bt[None, :, 2] * bt[None, :, 3] + bp[:, None, 2] * bp[:, None, 3] - s_inter
        iou = s_inter / s_union
        max_sort = jnp.argmax(iou, axis=0)
        d_xy = jnp.sum((bp[:, :2] - bt[:, :2]) ** 2, axis=1)
        d_wh = jnp.sum((jnp.sqrt(bp[:, 2:4]) - jnp.sqrt(bt[:, 2:4])) ** 2, axis=1)
        total_xy += jnp.sum(jnp.where(obj, d_xy[max_sort], 0.0))
        total_wh += jnp.sum(jnp.where(obj, d_wh[max_sort], 0.0))
        cnt = jnp.zeros(N).at[max_sort].add(jnp.where(obj, 1.0, 0.0))
        total_nocon += jnp.sum(jnp.where(cnt > 0, 0.0, bp[:, 4] ** 2))
    objb = target[:, :, 4] > 0
    conobj = jnp.sum(jnp.where(objb, (pred[:, :, 4] - target[:, :, 4]) ** 2, 0.0))
    cls = jnp.sum(jnp.where(objb[..., None],
                            (pred[:, :, 10:] - target[:, :, 10:]) ** 2, 0.0))
    return (lc * (total_xy + total_wh) + conobj + ln * total_nocon + cls) / B


if __name__ == "__main__":
    key = jax.random.PRNGKey(0)
    lambda_coord, lambda_noobj = 5.0, 0.5
    S, C = 8, 30                 # grid S=8 -> 64 cells/image, 30 channels/cell

    # B=2: tb=1, grid=(2,)  — both v7x TCs busy.
    # B=5: tb=3, grid=(2,) — exercises multi-image blocks + zero padding.
    for B in (2, 5):
        kp, kt, km, key = jax.random.split(key, 4)
        pred = jax.random.uniform(kp, (B, S, S, C), jnp.float32, minval=0.05, maxval=1.0)
        target = jax.random.uniform(kt, (B, S, S, C), jnp.float32, minval=0.05, maxval=1.0)
        # ~30% of cells contain an object (target confidence > 0), the rest exactly 0
        obj = jax.random.uniform(km, (B, S, S)) < 0.3
        target = target.at[..., 4].set(jnp.where(obj, target[..., 4], 0.0))

        loss = yolo_loss(pred, target, lambda_coord, lambda_noobj)
        loss = jax.block_until_ready(loss)
        ref = ref_loss(pred, target, lambda_coord, lambda_noobj)
        assert jnp.allclose(loss, ref, rtol=2e-3, atol=2e-3), (B, float(loss), float(ref))

    print("KERNEL_OK")
</pallas_src>

<mosaic_0001>
module attributes {stable_mosaic.version = 11 : i64} {
  func.func @_yolo_loss_kernel(%arg0: i32, %arg1: memref<1x30x64xf32, #tpu.memory_space<vmem>>, %arg2: memref<1x30x64xf32, #tpu.memory_space<vmem>>, %arg3: memref<1x64x5xf32, #tpu.memory_space<vmem>>, %arg4: memref<1x1x128xf32, #tpu.memory_space<vmem>>) attributes {dimension_semantics = [#tpu.dimension_semantics<parallel>], iteration_bounds = array<i64: 2>, scalar_prefetch = 0 : i64, scratch_operands = 0 : i64, tpu.core_type = #tpu.core_type<tc>, window_params = [{transform_indices = @transform_0, window_bounds = array<i64: 1, 30, 64>}, {transform_indices = @transform_1, window_bounds = array<i64: 1, 30, 64>}, {transform_indices = @transform_2, window_bounds = array<i64: 1, 64, 5>}, {transform_indices = @transform_3, window_bounds = array<i64: 1, 1, 128>}]} {
    %0 = tpu.iota {dimensions = array<i32: 1>} : vector<64x64xi32>
    %1 = tpu.iota {dimensions = array<i32: 1>} : vector<1x128xi32>
    %2 = tpu.iota {dimensions = array<i32: 0>} : vector<1x128xi32>
    %3 = tpu.iota {dimensions = array<i32: 0>} : vector<30x64xi32>
    %c10_i32 = arith.constant 10 : i32
    %4 = vector.broadcast %c10_i32 : i32 to vector<30x64xi32>
    %5 = arith.cmpi sge, %3, %4 : vector<30x64xi32>
    %cst = arith.constant 0.000000e+00 : f32
    %6 = vector.broadcast %cst : f32 to vector<1x128xf32>
    %c0_i32 = arith.constant 0 : i32
    %7 = arith.index_cast %c0_i32 : i32 to index
    %c0 = arith.constant 0 : index
    %c0_0 = arith.constant 0 : index
    %8 = vector.load %arg1[%7, %c0, %c0_0] : memref<1x30x64xf32, #tpu.memory_space<vmem>>, vector<1x30x64xf32>
    %9 = vector.shape_cast %8 : vector<1x30x64xf32> to vector<30x64xf32>
    %10 = arith.index_cast %c0_i32 : i32 to index
    %c0_1 = arith.constant 0 : index
    %c0_2 = arith.constant 0 : index
    %11 = vector.load %arg2[%10, %c0_1, %c0_2] : memref<1x30x64xf32, #tpu.memory_space<vmem>>, vector<1x30x64xf32>
    %12 = vector.shape_cast %11 : vector<1x30x64xf32> to vector<30x64xf32>
    %13 = arith.index_cast %c0_i32 : i32 to index
    %c0_3 = arith.constant 0 : index
    %c0_4 = arith.constant 0 : index
    %14 = vector.load %arg3[%13, %c0_3, %c0_4] : memref<1x64x5xf32, #tpu.memory_space<vmem>>, vector<1x64x5xf32>
    %15 = vector.shape_cast %14 : vector<1x64x5xf32> to vector<64x5xf32>
    %16 = vector.extract_strided_slice %9 {offsets = [0, 0], sizes = [1, 64], strides = [1, 1]} : vector<30x64xf32> to vector<1x64xf32>
    %17 = vector.extract_strided_slice %9 {offsets = [1, 0], sizes = [1, 64], strides = [1, 1]} : vector<30x64xf32> to vector<1x64xf32>
    %18 = vector.extract_strided_slice %9 {offsets = [2, 0], sizes = [1, 64], strides = [1, 1]} : vector<30x64xf32> to vector<1x64xf32>
    %19 = vector.extract_strided_slice %9 {offsets = [3, 0], sizes = [1, 64], strides = [1, 1]} : vector<30x64xf32> to vector<1x64xf32>
    %20 = vector.extract_strided_slice %9 {offsets = [4, 0], sizes = [1, 64], strides = [1, 1]} : vector<30x64xf32> to vector<1x64xf32>
    %21 = vector.extract_strided_slice %12 {offsets = [0, 0], sizes = [1, 64], strides = [1, 1]} : vector<30x64xf32> to vector<1x64xf32>
    %22 = vector.extract_strided_slice %12 {offsets = [1, 0], sizes = [1, 64], strides = [1, 1]} : vector<30x64xf32> to vector<1x64xf32>
    %23 = vector.extract_strided_slice %12 {offsets = [2, 0], sizes = [1, 64], strides = [1, 1]} : vector<30x64xf32> to vector<1x64xf32>
    %24 = vector.extract_strided_slice %12 {offsets = [3, 0], sizes = [1, 64], strides = [1, 1]} : vector<30x64xf32> to vector<1x64xf32>
    %25 = vector.extract_strided_slice %12 {offsets = [4, 0], sizes = [1, 64], strides = [1, 1]} : vector<30x64xf32> to vector<1x64xf32>
    %26 = vector.extract_strided_slice %15 {offsets = [0, 0], sizes = [64, 1], strides = [1, 1]} : vector<64x5xf32> to vector<64x1xf32>
    %27 = vector.extract_strided_slice %15 {offsets = [0, 1], sizes = [64, 1], strides = [1, 1]} : vector<64x5xf32> to vector<64x1xf32>
    %28 = vector.extract_strided_slice %15 {offsets = [0, 2], sizes = [64, 1], strides = [1, 1]} : vector<64x5xf32> to vector<64x1xf32>
    %29 = vector.extract_strided_slice %15 {offsets = [0, 3], sizes = [64, 1], strides = [1, 1]} : vector<64x5xf32> to vector<64x1xf32>
    %30 = vector.extract_strided_slice %15 {offsets = [0, 4], sizes = [64, 1], strides = [1, 1]} : vector<64x5xf32> to vector<64x1xf32>
    %31 = vector.broadcast %26 : vector<64x1xf32> to vector<64x64xf32>
    %32 = vector.broadcast %16 : vector<1x64xf32> to vector<64x64xf32>
    %33 = arith.subf %31, %32 : vector<64x64xf32>
    %34 = math.absf %33 : vector<64x64xf32>
    %35 = vector.broadcast %27 : vector<64x1xf32> to vector<64x64xf32>
    %36 = vector.broadcast %17 : vector<1x64xf32> to vector<64x64xf32>
    %37 = arith.subf %35, %36 : vector<64x64xf32>
    %38 = math.absf %37 : vector<64x64xf32>
    %39 = vector.broadcast %28 : vector<64x1xf32> to vector<64x64xf32>
    %40 = vector.broadcast %18 : vector<1x64xf32> to vector<64x64xf32>
    %41 = arith.addf %39, %40 : vector<64x64xf32>
    %cst_5 = arith.constant 5.000000e-01 : f32
    %42 = vector.broadcast %cst_5 : f32 to vector<64x64xf32>
    %43 = arith.mulf %41, %42 : vector<64x64xf32>
    %44 = arith.subf %43, %34 : vector<64x64xf32>
    %45 = vector.broadcast %29 : vector<64x1xf32> to vector<64x64xf32>
    %46 = vector.broadcast %19 : vector<1x64xf32> to vector<64x64xf32>
    %47 = arith.addf %45, %46 : vector<64x64xf32>
    %cst_6 = arith.constant 5.000000e-01 : f32
    %48 = vector.broadcast %cst_6 : f32 to vector<64x64xf32>
    %49 = arith.mulf %47, %48 : vector<64x64xf32>
    %50 = arith.subf %49, %38 : vector<64x64xf32>
    %51 = arith.mulf %44, %50 : vector<64x64xf32>
    %cst_7 = arith.constant 0.000000e+00 : f32
    %52 = vector.broadcast %cst_7 : f32 to vector<64x64xf32>
    %53 = arith.maximumf %51, %52 : vector<64x64xf32>
    %54 = arith.mulf %28, %29 : vector<64x1xf32>
    %55 = arith.mulf %18, %19 : vector<1x64xf32>
    %56 = vector.broadcast %54 : vector<64x1xf32> to vector<64x64xf32>
    %57 = vector.broadcast %55 : vector<1x64xf32> to vector<64x64xf32>
    %58 = arith.addf %56, %57 : vector<64x64xf32>
    %59 = arith.subf %58, %53 : vector<64x64xf32>
    %60 = arith.divf %53, %59 : vector<64x64xf32>
    %cst_8 = arith.constant dense<0xFF800000> : vector<64xf32>
    %61 = vector.multi_reduction <maximumf>, %60, %cst_8 [1] : vector<64x64xf32> to vector<64xf32>
    %62 = vector.shape_cast %61 : vector<64xf32> to vector<64x1xf32>
    %63 = vector.broadcast %62 : vector<64x1xf32> to vector<64x64xf32>
    %64 = arith.cmpf oeq, %60, %63 : vector<64x64xf32>
    %c64_i32 = arith.constant 64 : i32
    %65 = vector.broadcast %c64_i32 : i32 to vector<64x64xi32>
    %66 = arith.select %64, %0, %65 : vector<64x64xi1>, vector<64x64xi32>
    %cst_9 = arith.constant dense<2147483647> : vector<64xi32>
    %67 = vector.multi_reduction <minsi>, %66, %cst_9 [1] : vector<64x64xi32> to vector<64xi32>
    %68 = vector.shape_cast %67 : vector<64xi32> to vector<64x1xi32>
    %cst_10 = arith.constant 0.000000e+00 : f32
    %69 = vector.broadcast %cst_10 : f32 to vector<64x1xf32>
    %70 = arith.cmpf ogt, %30, %69 : vector<64x1xf32>
    %71 = vector.broadcast %68 : vector<64x1xi32> to vector<64x64xi32>
    %72 = arith.cmpi eq, %71, %0 : vector<64x64xi32>
    %73 = vector.broadcast %70 : vector<64x1xi1> to vector<64x64xi1>
    %74 = arith.andi %72, %73 : vector<64x64xi1>
    %cst_11 = arith.constant 1.000000e+00 : f32
    %cst_12 = arith.constant 0.000000e+00 : f32
    %75 = vector.broadcast %cst_11 : f32 to vector<64x64xf32>
    %76 = vector.broadcast %cst_12 : f32 to vector<64x64xf32>
    %77 = arith.select %74, %75, %76 : vector<64x64xi1>, vector<64x64xf32>
    %cst_13 = arith.constant dense<0.000000e+00> : vector<64xf32>
    %78 = vector.multi_reduction <add>, %77, %cst_13 [0] : vector<64x64xf32> to vector<64xf32>
    %79 = vector.shape_cast %78 : vector<64xf32> to vector<1x64xf32>
    %80 = arith.subf %16, %21 : vector<1x64xf32>
    %81 = arith.mulf %80, %80 : vector<1x64xf32>
    %82 = arith.subf %17, %22 : vector<1x64xf32>
    %83 = arith.mulf %82, %82 : vector<1x64xf32>
    %84 = arith.addf %81, %83 : vector<1x64xf32>
    %85 = math.sqrt %18 : vector<1x64xf32>
    %86 = math.sqrt %23 : vector<1x64xf32>
    %87 = arith.subf %85, %86 : vector<1x64xf32>
    %88 = arith.mulf %87, %87 : vector<1x64xf32>
    %89 = math.sqrt %19 : vector<1x64xf32>
    %90 = math.sqrt %24 : vector<1x64xf32>
    %91 = arith.subf %89, %90 : vector<1x64xf32>
    %92 = arith.mulf %91, %91 : vector<1x64xf32>
    %93 = arith.addf %88, %92 : vector<1x64xf32>
    %94 = arith.mulf %79, %84 : vector<1x64xf32>
    %cst_14 = arith.constant dense<0.000000e+00> : vector<1xf32>
    %95 = vector.multi_reduction <add>, %94, %cst_14 [1] : vector<1x64xf32> to vector<1xf32>
    %96 = vector.shape_cast %95 : vector<1xf32> to vector<1x1xf32>
    %97 = arith.mulf %79, %93 : vector<1x64xf32>
    %cst_15 = arith.constant dense<0.000000e+00> : vector<1xf32>
    %98 = vector.multi_reduction <add>, %97, %cst_15 [1] : vector<1x64xf32> to vector<1xf32>
    %99 = vector.shape_cast %98 : vector<1xf32> to vector<1x1xf32>
    %cst_16 = arith.constant 0.000000e+00 : f32
    %100 = vector.broadcast %cst_16 : f32 to vector<1x64xf32>
    %101 = arith.cmpf ogt, %79, %100 : vector<1x64xf32>
    %102 = arith.mulf %20, %20 : vector<1x64xf32>
    %cst_17 = arith.constant 0.000000e+00 : f32
    %103 = vector.broadcast %cst_17 : f32 to vector<1x64xf32>
    %104 = arith.select %101, %103, %102 : vector<1x64xi1>, vector<1x64xf32>
    %cst_18 = arith.constant dense<0.000000e+00> : vector<1xf32>
    %105 = vector.multi_reduction <add>, %104, %cst_18 [1] : vector<1x64xf32> to vector<1xf32>
    %106 = vector.shape_cast %105 : vector<1xf32> to vector<1x1xf32>
    %cst_19 = arith.constant 0.000000e+00 : f32
    %107 = vector.broadcast %cst_19 : f32 to vector<1x64xf32>
    %108 = arith.cmpf ogt, %25, %107 : vector<1x64xf32>
    %109 = arith.subf %20, %25 : vector<1x64xf32>
    %110 = arith.mulf %109, %109 : vector<1x64xf32>
    %cst_20 = arith.constant 0.000000e+00 : f32
    %111 = vector.broadcast %cst_20 : f32 to vector<1x64xf32>
    %112 = arith.select %108, %110, %111 : vector<1x64xi1>, vector<1x64xf32>
    %cst_21 = arith.constant dense<0.000000e+00> : vector<1xf32>
    %113 = vector.multi_reduction <add>, %112, %cst_21 [1] : vector<1x64xf32> to vector<1xf32>
    %114 = vector.shape_cast %113 : vector<1xf32> to vector<1x1xf32>
    %115 = arith.subf %9, %12 : vector<30x64xf32>
    %116 = arith.mulf %115, %115 : vector<30x64xf32>
    %117 = vector.broadcast %108 : vector<1x64xi1> to vector<30x64xi1>
    %118 = arith.andi %5, %117 : vector<30x64xi1>
    %cst_22 = arith.constant 0.000000e+00 : f32
    %119 = vector.broadcast %cst_22 : f32 to vector<30x64xf32>
    %120 = arith.select %118, %116, %119 : vector<30x64xi1>, vector<30x64xf32>
    %cst_23 = arith.constant dense<0.000000e+00> : vector<30xf32>
    %121 = vector.multi_reduction <add>, %120, %cst_23 [1] : vector<30x64xf32> to vector<30xf32>
    %122 = vector.shape_cast %121 : vector<30xf32> to vector<30x1xf32>
    %cst_24 = arith.constant dense<0.000000e+00> : vector<1xf32>
    %123 = vector.multi_reduction <add>, %122, %cst_24 [0] : vector<30x1xf32> to vector<1xf32>
    %124 = vector.shape_cast %123 : vector<1xf32> to vector<1x1xf32>
    %c0_i32_25 = arith.constant 0 : i32
    %125 = vector.broadcast %c0_i32_25 : i32 to vector<1x128xi32>
    %126 = arith.cmpi eq, %1, %125 : vector<1x128xi32>
    %cst_26 = arith.constant 0.000000e+00 : f32
    %127 = vector.shape_cast %96 : vector<1x1xf32> to vector<1x1xf32>
    %128 = vector.broadcast %127 : vector<1x1xf32> to vector<1x128xf32>
    %129 = vector.broadcast %cst_26 : f32 to vector<1x128xf32>
    %130 = arith.select %126, %128, %129 : vector<1x128xi1>, vector<1x128xf32>
    %c1_i32 = arith.constant 1 : i32
    %131 = vector.broadcast %c1_i32 : i32 to vector<1x128xi32>
    %132 = arith.cmpi eq, %1, %131 : vector<1x128xi32>
    %cst_27 = arith.constant 0.000000e+00 : f32
    %133 = vector.shape_cast %99 : vector<1x1xf32> to vector<1x1xf32>
    %134 = vector.broadcast %133 : vector<1x1xf32> to vector<1x128xf32>
    %135 = vector.broadcast %cst_27 : f32 to vector<1x128xf32>
    %136 = arith.select %132, %134, %135 : vector<1x128xi1>, vector<1x128xf32>
    %137 = arith.addf %130, %136 : vector<1x128xf32>
    %c2_i32 = arith.constant 2 : i32
    %138 = vector.broadcast %c2_i32 : i32 to vector<1x128xi32>
    %139 = arith.cmpi eq, %1, %138 : vector<1x128xi32>
    %cst_28 = arith.constant 0.000000e+00 : f32
    %140 = vector.shape_cast %106 : vector<1x1xf32> to vector<1x1xf32>
    %141 = vector.broadcast %140 : vector<1x1xf32> to vector<1x128xf32>
    %142 = vector.broadcast %cst_28 : f32 to vector<1x128xf32>
    %143 = arith.select %139, %141, %142 : vector<1x128xi1>, vector<1x128xf32>
    %144 = arith.addf %137, %143 : vector<1x128xf32>
    %c3_i32 = arith.constant 3 : i32
    %145 = vector.broadcast %c3_i32 : i32 to vector<1x128xi32>
    %146 = arith.cmpi eq, %1, %145 : vector<1x128xi32>
    %cst_29 = arith.constant 0.000000e+00 : f32
    %147 = vector.shape_cast %114 : vector<1x1xf32> to vector<1x1xf32>
    %148 = vector.broadcast %147 : vector<1x1xf32> to vector<1x128xf32>
    %149 = vector.broadcast %cst_29 : f32 to vector<1x128xf32>
    %150 = arith.select %146, %148, %149 : vector<1x128xi1>, vector<1x128xf32>
    %151 = arith.addf %144, %150 : vector<1x128xf32>
    %c4_i32 = arith.constant 4 : i32
    %152 = vector.broadcast %c4_i32 : i32 to vector<1x128xi32>
    %153 = arith.cmpi eq, %1, %152 : vector<1x128xi32>
    %cst_30 = arith.constant 0.000000e+00 : f32
    %154 = vector.shape_cast %124 : vector<1x1xf32> to vector<1x1xf32>
    %155 = vector.broadcast %154 : vector<1x1xf32> to vector<1x128xf32>
    %156 = vector.broadcast %cst_30 : f32 to vector<1x128xf32>
    %157 = arith.select %153, %155, %156 : vector<1x128xi1>, vector<1x128xf32>
    %158 = arith.addf %151, %157 : vector<1x128xf32>
    %159 = vector.broadcast %c0_i32 : i32 to vector<1x128xi32>
    %160 = arith.cmpi eq, %2, %159 : vector<1x128xi32>
    %cst_31 = arith.constant 0.000000e+00 : f32
    %161 = vector.broadcast %cst_31 : f32 to vector<1x128xf32>
    %162 = arith.select %160, %158, %161 : vector<1x128xi1>, vector<1x128xf32>
    %163 = arith.addf %6, %162 : vector<1x128xf32>
    %c1_i32_32 = arith.constant 1 : i32
    %c0_33 = arith.constant 0 : index
    %c0_34 = arith.constant 0 : index
    %c0_35 = arith.constant 0 : index
    %164 = vector.load %arg4[%c0_33, %c0_34, %c0_35] : memref<1x1x128xf32, #tpu.memory_space<vmem>>, vector<1x1x128xf32>
    %165 = vector.shape_cast %164 : vector<1x1x128xf32> to vector<1x128xf32>
    %166 = vector.shape_cast %163 : vector<1x128xf32> to vector<1x1x128xf32>
    tpu.vector_store %arg4[%c0_33, %c0_34, %c0_35], %166 {strides = array<i32>} : memref<1x1x128xf32, #tpu.memory_space<vmem>>, vector<1x1x128xf32>,
    return
  }
  func.func @transform_0(%arg0: i32) -> (i32, i32, i32) {
    %c0_i32 = arith.constant 0 : i32
    %c0_i32_0 = arith.constant 0 : i32
    %c0_i32_1 = arith.constant 0 : i32
    return %arg0, %c0_i32, %c0_i32_0 : i32, i32, i32
  }
  func.func @transform_1(%arg0: i32) -> (i32, i32, i32) {
    %c0_i32 = arith.constant 0 : i32
    %c0_i32_0 = arith.constant 0 : i32
    %c0_i32_1 = arith.constant 0 : i32
    return %arg0, %c0_i32, %c0_i32_0 : i32, i32, i32
  }
  func.func @transform_2(%arg0: i32) -> (i32, i32, i32) {
    %c0_i32 = arith.constant 0 : i32
    %c0_i32_0 = arith.constant 0 : i32
    %c0_i32_1 = arith.constant 0 : i32
    return %arg0, %c0_i32, %c0_i32_0 : i32, i32, i32
  }
  func.func @transform_3(%arg0: i32) -> (i32, i32, i32) {
    %c0_i32 = arith.constant 0 : i32
    %c0_i32_0 = arith.constant 0 : i32
    %c0_i32_1 = arith.constant 0 : i32
    return %arg0, %c0_i32, %c0_i32_0 : i32, i32, i32
  }
}

</mosaic_0001>

<bundles_post_ra>
// kernel: tpu_custom_call.1
= control target key start
LH: loop header
LB: loop body
LE: loop exit
PB: predicated region body
PF: predicated region fallthrough
CT: control target
= control target key end

     0   :  { %8 = vsyncpa [#allocation3], 0  ;;  %s1893_s0 = inlined_call_operand.vmem [shape: f32[2,30,64], index: 0, kind: input, shape index: {}]   ;;  %s1894_s1 = inlined_call_operand.vmem [shape: f32[2,30,64], index: 1, kind: input, shape index: {}]   ;;  %s1895_s2 = inlined_call_operand.vmem [shape: f32[2,64,5], index: 2, kind: input, shape index: {}]   ;;  %s1896_s3 = inlined_call_operand.hbm [shape: f32[2,1,128], index: 3, kind: output, shape index: {}]  }
   0x1   :  { %10 = vsyncpa [#allocation3 + $0x1], 0  ;;  %s1348_s12 = smov 0   ;;  %s1350_s13 = smov 0  }
   0x2   :  { %s1352_s14 = smov 0   ;;  %s1354_s15 = smov 0  }
   0x3 LB: > { %s1369_s16 = sadd.s32 4294967295, %s1319_s15   ;;  %s1156_s17 = sadd.s32 4294967294, %s1319_s15   ;;  %s1319_s15 = sphi %s1354_s15, %s1906_s15   ;;  %s1315_s14 = sphi %s1352_s14, %s1905_s14   ;;  %s1311_s13 = sphi %s1350_s13, %s1904_s13   ;;  %s1307_s12 = sphi %s1348_s12, %s1903_s12  }
   0x4   : > { %s1373_s18 = sadd.s32 1, %s1319_s15   ;;  %s101_s19 = sadd.s32 1, %s1315_s14 }
   0x5   : > { %s98_s20 = ssub.s32 %s1319_s15, %s1373_s18  ;;  %p111_p0 = scmp.ne.s32.totalorder %s1315_s14, %s1311_s13 }
   0x6   : > { %p99_p1 = scmp.eq.s32.totalorder %s98_s20, 0  ;;  %p112_p2 = scmp.eq.s32.totalorder %s1369_s16, 1 }
   0x7   : > { %p117_p3 = scmp.ne.s32.totalorder %s1311_s13, %s1307_s12  ;;  %p118_p4 = scmp.eq.s32.totalorder %s1156_s17, 1 }
   0x8   : > { %s1384_s21 = scalar_select %p99_p1, %s1315_s14, %s101_s19  }
   0x9   : > { %p1386_p5 = por %p112_p2, %p111_p0  ;;  %p1390_p6 = por %p118_p4, %p117_p3 }
   0xa   : > { %p1159_p7 = scmp.ge.s32.totalorder %s1319_s15, 1  ;;  %p160_p8 = scmp.lt.s32.totalorder %s1319_s15, 3 }
   0xc   : > { %p161_p9 = pnand %p1159_p7, %p160_p8 }
   0xd   : > { %p193_p10 = scmp.lt.s32.totalorder (!%p161_p9), %s1369_s16, 1  ;;  %s1324_s29 = smov (!%p161_p9), 127  }
   0xe   : > { %164 = sbr.rel (%p161_p9) target bundleno = 954 (0x3ba), region = 32  ;;  %s191_s10 = sand.u32 (!%p161_p9), 1, %s1311_s13  }
   0xf   : > { %s1073_s19 = scalar_lea.hbm (!%p161_p9), %s1896_s3, %s1369_s16  ;;  %s192_s20 = scalar_lea.vmem (!%p161_p9), [#allocation2], %s191_s10 }
  0x10   : > { %s1065_s26 = scalar_lea.sflag (!%p161_p9), [#allocation3], %s191_s10 }
  0x13   : > { %v1321_v0 = vmov 0   ;;  %s1401_s24 = scalar_select %p193_p10, %s1369_s16, 1  ;;  %v1322_v9 = vmov 1   ;;  %v1323_v10 = vmov 2   ;;  %v1325_v11 = vmov 3  }
  0x14   : > { %1219 = vset.pattern.permute.xlu2 %v1321_v0  ;;  %1218 = vset.pattern.permute.xlu1 %v1321_v0  ;;  %vm684_vm4 = vcmask 523264  }
  0x15   : > { %1217 = vset.pattern.permute.xlu0 %v1321_v0  ;;  %s1170_s25 = sshll.u32 %s1401_s24, 6  ;;  %s1168_s30 = sshll.u32 %s1401_s24, 5 }
  0x16   : > { %s207_s28 = scalar_lea.vmem %s1895_s2, %s1170_s25  ;;  %s1477_s6 = scalar_lea.vmem %s1893_s0, %s1168_s30 }
  0x17   : > { %v1407_v1 = vld [vmem:[%s207_s28 + $0x20] sm:$0xff]  ;;  %v1409_v2 = vld [vmem:[%s207_s28 + $0x10] sm:$0xff]  ;;  %v1416_v4 = vld [vmem:[%s207_s28 + $0x28] sm:$0xff]  ;;  %s202_s9 = scalar_lea.vmem %s1894_s1, %s1168_s30  ;;  %s1075_s24 = sshll.u32 %s192_s20, 4  ;;  %s1076_s24 = int_to_ptr.vmem [resolvable:$true] %s1075_s24 }
  0x18   : > { %257 = vperm.xlu2 %1219, %v1407_v1   ;;  %247 = vperm.xlu1 %1218, %v1409_v2   ;;  %v1413_v3 = vld [vmem:[%s207_s28] sm:$0xff]  ;;  %v1418_v5 = vld [vmem:[%s207_s28 + $0x18] sm:$0xff]  ;;  %v1420_v6 = vld [vmem:[%s207_s28 + $0x8] sm:$0xff]  ;;  %s1077_s25 = sshll.u32 %s1073_s19, 4  ;;  %s1277_s30 = scalar_lea.hbm %s1896_s3, 2  ;;  %s1078_s25 = int_to_ptr.hbm [resolvable:$true] %s1077_s25 }
  0x19   : > { %237 = vperm.xlu0 %1217, %v1413_v3   ;;  %v1425_v7 = vld [vmem:[%s207_s28 + $0x38] sm:$0xff]  ;;  %v1427_v8 = vld [vmem:[%s207_s28 + $0x30] sm:$0xff]  ;;  %v1484_v21 = vld [vmem:[%s1477_s6] sm:$0xff]  ;;  %s1271_s27 = sshra.s32 %s1078_s25, 4  ;;  %s1272_s27 = int_to_ptr.hbm [resolvable:$true] %s1271_s27 }
  0x1a   : > { %v1487_v22 = vperm.slane %v1484_v21, 0  ;;  %v1497_v27 = vperm.slane %v1484_v21, 2  ;;  %v1518_v45 = vperm.slane %v1484_v21, 1  ;;  %v1529_v60 = vperm.slane %v1484_v21, 3  ;;  %s1273_s16 = scalar_lea.hbm %s1272_s27, 1  ;;  %p1278_p0 = scmp.lt.s32.totalorder %s1272_s27, %s1896_s3 }
  0x1b   : > { %p1274_p11 = scmp.ne.s32.totalorder %s1272_s27, %s1273_s16  ;;  %p1279_p1 = scmp.lt.s32.totalorder %s1277_s30, %s1273_s16 }
  0x1d   : > { %p1275_p12 = pnand %p1274_p11, %p1386_p5  ;;  %p1280_p2 = por %p1279_p1, %p1278_p0 }
  0x1f   : > { %p1276_p13 = pneg %p1275_p12 }
  0x20   : > { %262 = vperm.xlu2 %1219, %v1416_v4   ;;  %252 = vperm.xlu1 %1218, %v1418_v5  }
  0x21   : > { %242 = vperm.xlu0 %1217, %v1420_v6   ;;  %p1281_p3 = pnand %p1280_p2, %p1276_p13 }
  0x28   : > { %1220 = vset.pattern.permute.xlu2 %v1322_v9  ;;  %272 = vperm.xlu1 %1218, %v1425_v7  }
  0x29   : > { %267 = vperm.xlu0 %1217, %v1427_v8   ;;  %293 = vperm.xlu2 %1220, %v1413_v3  }
  0x30   : > { %1222 = vset.pattern.permute.xlu1 %v1322_v9 }
  0x31   : > { %1221 = vset.pattern.permute.xlu0 %v1322_v9  ;;  %301 = vperm.xlu1 %1222, %v1409_v2  }
  0x32   : > { %305 = vperm.xlu2 %1220, %v1418_v5   ;;  %297 = vperm.xlu0 %1221, %v1420_v6  }
  0x39   : > { %309 = vperm.xlu1 %1222, %v1407_v1  }
  0x3a   : > { %313 = vperm.xlu2 %1220, %v1416_v4   ;;  %317 = vperm.xlu0 %1221, %v1427_v8  }
  0x41   : > { %321 = vperm.xlu1 %1222, %v1425_v7  }
  0x42   : > { %1223 = vset.pattern.permute.xlu2 %v1323_v10  ;;  %475 = vrot.lane.b32.xlu0 %v1409_v2, %s1324_s29 }
  0x43   : > { %342 = vperm.xlu2 %1223, %v1413_v3   ;;  %1227 = vset.pattern.permute.xlu0 %v1325_v11 }
  0x49   : > { %1224 = vset.pattern.permute.xlu1 %v1323_v10 }
  0x4a   : > { %481 = vrot.lane.b32.xlu0 %v1416_v4, %s1324_s29  ;;  %350 = vperm.xlu1 %1224, %v1409_v2  }
  0x4b   : > { %354 = vperm.xlu2 %1223, %v1418_v5  }
  0x52   : > { %407 = vperm.xlu0 %1227, %v1409_v2   ;;  %471 = vrot.lane.b32.xlu1 %v1413_v3, %s1324_s29 }
  0x53   : > { %473 = vrot.lane.b32.xlu2 %v1420_v6, %s1324_s29  ;;  %1225 = vset.pattern.permute.xlu1 %v1325_v11 }
  0x54   : > { %1226 = vset.pattern.permute.xlu2 %v1325_v11 }
  0x5a   : > { %1228 = vset.pattern.permute.xlu0 %v1323_v10  ;;  %477 = vrot.lane.b32.xlu1 %v1418_v5, %s1324_s29 }
  0x5b   : > { %479 = vrot.lane.b32.xlu2 %v1407_v1, %s1324_s29  ;;  %346 = vperm.xlu0 %1228, %v1420_v6  }
  0x62   : > { %483 = vrot.lane.b32.xlu1 %v1427_v8, %s1324_s29 }
  0x63   : > { %485 = vrot.lane.b32.xlu2 %v1425_v7, %s1324_s29  ;;  %358 = vperm.xlu0 %1228, %v1407_v1  }
  0x6a   : > { %399 = vperm.xlu1 %1225, %v1413_v3  }
  0x6b   : > { %403 = vperm.xlu2 %1226, %v1420_v6   ;;  %370 = vperm.xlu0 %1228, %v1425_v7  }
  0x72   : > { %411 = vperm.xlu1 %1225, %v1418_v5   ;;  %v1457_v12 = vpop.permute.xlu2 %257 }
  0x73   : > { %415 = vperm.xlu2 %1226, %v1407_v1  }
  0x7a   : > { %1229 = vset.pattern.permute.xlu1 %v1323_v10  ;;  %v1460_v13 = vpop.permute.xlu2 %262 }
  0x7b   : > { %419 = vperm.xlu2 %1226, %v1416_v4   ;;  %362 = vperm.xlu1 %1229, %v1416_v4  }
  0x83   : > { %1230 = vset.pattern.permute.xlu2 %v1323_v10  ;;  %1231 = vset.pattern.permute.xlu1 %v1325_v11  ;;  %v1464_v14 = vpop.permute.xlu2 %293 }
  0x84   : > { %366 = vperm.xlu2 %1230, %v1427_v8   ;;  %423 = vperm.xlu1 %1231, %v1427_v8  }
  0x8a   : > { %v248_v15 = vpop.permute.xlu1 %247 }
  0x8b   : > { %v238_v16 = vpop.permute.xlu0 %237  ;;  %v278_v51 = vsub.f32 %v248_v15, %v1487_v22 }
  0x8c   : > { %427 = vperm.xlu1 %1231, %v1425_v7   ;;  %v1469_v17 = vpop.permute.xlu2 %305  ;;  %v276_v23 = vsub.f32 %v238_v16, %v1487_v22 }
  0x8d   : > { %v286_v57 = vand.u32 2147483647, %v278_v51 }
  0x8e   : > { %v1499_v29 = vand.u32 2147483647, %v276_v23 }
  0x92   : > { %v253_v18 = vpop.permute.xlu1 %252 }
  0x93   : > { %v1479_v19 = vpop.permute.xlu0 %242  ;;  %v279_v34 = vsub.f32 %v253_v18, %v1487_v22 }
  0x94   : > { %v1481_v20 = vpop.permute.xlu2 %313  ;;  %1232 = vset.pattern.permute.xlu1 %v1323_v10 }
  0x95   : > { %v1508_v38 = vand.u32 2147483647, %v279_v34 }
  0x9a   : > { %v1490_v24 = vpop.permute.xlu1 %272 }
  0x9b   : > { %v283_v25 = vsub.f32 %v1490_v24, %v1487_v22  ;;  %v1494_v26 = vpop.permute.xlu0 %267 }
  0x9d   : > { %v343_v28 = vpop.permute.xlu2 %342 }
  0x9e   : > { %v374_v30 = vadd.f32 %v1497_v27, %v343_v28 }
  0xa0   : > { %v1502_v31 = vmul.f32 0.5, %v374_v30  ;;  %v277_v30 = vsub.f32 %v1479_v19, %v1487_v22 }
  0xa2   : > { %v390_v32 = vsub.f32 %v1502_v31, %v1499_v29  ;;  %v330_v29 = vsub.f32 %v1481_v20, %v1518_v45 }
  0xa3   : > { %v302_v33 = vpop.permute.xlu1 %301 }
  0xa4   : > { %v298_v35 = vpop.permute.xlu0 %297  ;;  %v327_v61 = vsub.f32 %v302_v33, %v1518_v45 }
  0xa5   : > { %v355_v36 = vpop.permute.xlu2 %354  ;;  %v326_v18 = vsub.f32 %v298_v35, %v1518_v45  ;;  %v285_v35 = vand.u32 2147483647, %v277_v30 }
  0xa6   : > { %v377_v37 = vadd.f32 %v1497_v27, %v355_v36  ;;  %v335_v15 = vand.u32 2147483647, %v327_v61 }
  0xa7   : > { %v334_v36 = vand.u32 2147483647, %v326_v18  ;;  %v325_v18 = vsub.f32 %v1464_v14, %v1518_v45 }
  0xa8   : > { %v1510_v39 = vmul.f32 0.5, %v377_v37 }
  0xaa   : > { %v393_v40 = vsub.f32 %v1510_v39, %v1508_v38 }
  0xab   : > { %v310_v41 = vpop.permute.xlu1 %309 }
  0xac   : > { %v1514_v42 = vpop.permute.xlu0 %317  ;;  %v329_v37 = vsub.f32 %v310_v41, %v1518_v45 }
  0xad   : > { %v474_v43 = vpop.permute.xlu2 %473  ;;  %v331_v20 = vsub.f32 %v1514_v42, %v1518_v45  ;;  %v291_v42 = vand.u32 2147483647, %v283_v25 }
  0xae   : > { %v496_v44 = vmul.f32 %v474_v43, %v1420_v6  ;;  %v337_v19 = vand.u32 2147483647, %v329_v37 }
  0xb0   : > { %514 = vperm.xlu1 %1232, %v496_v44  }
  0xb3   : > { %v1520_v46 = vpop.permute.xlu1 %321 }
  0xb4   : > { %v332_v47 = vsub.f32 %v1520_v46, %v1518_v45  ;;  %v476_v48 = vpop.permute.xlu0 %475 }
  0xb5   : > { %v497_v49 = vmul.f32 %v476_v48, %v1409_v2  ;;  %v480_v50 = vpop.permute.xlu2 %479 }
  0xb6   : > { %v499_v33 = vmul.f32 %v480_v50, %v1407_v1 }
  0xb7   : > { %519 = vperm.xlu2 %1230, %v497_v49  }
  0xbc   : > { %v482_v52 = vpop.permute.xlu0 %481  ;;  %v351_v53 = vpop.permute.xlu1 %350 }
  0xbd   : > { %v500_v54 = vmul.f32 %v482_v52, %v1416_v4  ;;  %v376_v55 = vadd.f32 %v1497_v27, %v351_v53  ;;  %v486_v56 = vpop.permute.xlu2 %485 }
  0xbe   : > { %v502_v41 = vmul.f32 %v486_v56, %v1425_v7 }
  0xbf   : > { %v384_v58 = vmul.f32 0.5, %v376_v55  ;;  %534 = vperm.xlu1 %1232, %v500_v54  }
  0xc1   : > { %v392_v59 = vsub.f32 %v384_v58, %v286_v57 }
  0xc4   : > { %v408_v62 = vpop.permute.xlu0 %407  ;;  %v472_v63 = vpop.permute.xlu1 %471 }
  0xc5   : > { %v433_v9 = vadd.f32 %v1529_v60, %v408_v62  ;;  %v495_v10 = vmul.f32 %v472_v63, %v1413_v3  ;;  %v404_v11 = vpop.permute.xlu2 %403 }
  0xc6   : > { %v432_v23 = vadd.f32 %v1529_v60, %v404_v11 }
  0xc7   : > { %v441_v16 = vmul.f32 0.5, %v433_v9  ;;  %509 = vperm.xlu0 %1228, %v495_v10  }
  0xc8   : > { %v440_v43 = vmul.f32 0.5, %v432_v23 }
  0xc9   : > { %v449_v28 = vsub.f32 %v441_v16, %v335_v15 }
  0xca   : > { %v448_v50 = vsub.f32 %v440_v43, %v334_v36  ;;  %v328_v36 = vsub.f32 %v1469_v17, %v1518_v45  ;;  %v281_v17 = vsub.f32 %v1460_v13, %v1487_v22  ;;  %v282_v13 = vsub.f32 %v1494_v26, %v1487_v22 }
  0xcb   : > { %v1539_v34 = vmul.f32 %v449_v28, %v392_v59  ;;  %v280_v59 = vsub.f32 %v1457_v12, %v1487_v22  ;;  %v333_v28 = vand.u32 2147483647, %v325_v18 }
  0xcc   : > { %v478_v44 = vpop.permute.xlu1 %477 }
  0xcd   : > { %v498_v48 = vmul.f32 %v478_v44, %v1418_v5  ;;  %v416_v49 = vpop.permute.xlu2 %415  ;;  %v347_v51 = vpop.permute.xlu0 %346  ;;  %v288_v11 = vand.u32 2147483647, %v280_v59 }
  0xce   : > { %v435_v52 = vadd.f32 %v1529_v60, %v416_v49  ;;  %v375_v53 = vadd.f32 %v1497_v27, %v347_v51 }
  0xcf   : > { %529 = vperm.xlu0 %1228, %v499_v33   ;;  %524 = vperm.xlu2 %1230, %v498_v48   ;;  %v336_v48 = vand.u32 2147483647, %v328_v36 }
  0xd0   : > { %v443_v54 = vmul.f32 0.5, %v435_v52  ;;  %v383_v55 = vmul.f32 0.5, %v375_v53 }
  0xd2   : > { %v451_v57 = vsub.f32 %v443_v54, %v337_v19  ;;  %v391_v58 = vsub.f32 %v383_v55, %v285_v35  ;;  %v289_v19 = vand.u32 2147483647, %v281_v17 }
  0xd4   : > { %v484_v61 = vpop.permute.xlu1 %483  ;;  %v1548_v62 = vmul.f32 %v448_v50, %v391_v58  ;;  %v338_v50 = vand.u32 2147483647, %v330_v29 }
  0xd5   : > { %v501_v63 = vmul.f32 %v484_v61, %v1427_v8  ;;  %v359_v9 = vpop.permute.xlu0 %358  ;;  %v420_v14 = vpop.permute.xlu2 %419 }
  0xd6   : > { %v378_v10 = vadd.f32 %v1497_v27, %v359_v9  ;;  %v436_v35 = vadd.f32 %v1529_v60, %v420_v14  ;;  %v339_v9 = vand.u32 2147483647, %v331_v20  ;;  %v464_v17 = vmax.f32 %v1548_v62, 0.0 }
  0xd7   : > { %544 = vperm.xlu0 %1228, %v502_v41   ;;  %539 = vperm.xlu2 %1230, %v501_v63   ;;  %v290_v63 = vand.u32 2147483647, %v282_v13 }
  0xd8   : > { %v386_v15 = vmul.f32 0.5, %v378_v10 }
  0xda   : > { %v394_v16 = vsub.f32 %v386_v15, %v288_v11 }
  0xdc   : > { %v400_v56 = vpop.permute.xlu1 %399  ;;  %v1554_v23 = vmul.f32 %v451_v57, %v394_v16 }
  0xdd   : > { %v431_v12 = vadd.f32 %v1529_v60, %v400_v56  ;;  %v371_v61 = vpop.permute.xlu0 %370 }
  0xde   : > { %v367_v54 = vpop.permute.xlu2 %366  ;;  %v381_v11 = vadd.f32 %v1497_v27, %v371_v61 }
  0xdf   : > { %v439_v30 = vmul.f32 0.5, %v431_v12  ;;  %v380_v38 = vadd.f32 %v1497_v27, %v367_v54 }
  0xe0   : > { %v389_v12 = vmul.f32 0.5, %v381_v11 }
  0xe1   : > { %v447_v33 = vsub.f32 %v439_v30, %v333_v28  ;;  %v388_v41 = vmul.f32 0.5, %v380_v38  ;;  %v340_v28 = vand.u32 2147483647, %v332_v47 }
  0xe3   : > { %v1562_v37 = vmul.f32 %v447_v33, %v390_v32  ;;  %v444_v32 = vmul.f32 0.5, %v436_v35  ;;  %v396_v15 = vsub.f32 %v388_v41, %v290_v63  ;;  %v397_v33 = vsub.f32 %v389_v12, %v291_v42 }
  0xe4   : > { %v412_v43 = vpop.permute.xlu1 %411 }
  0xe5   : > { %v434_v44 = vadd.f32 %v1529_v60, %v412_v43  ;;  %v452_v57 = vsub.f32 %v444_v32, %v338_v50  ;;  %v504_v43 = vrot.slane %v1484_v21, 1 }
  0xe7   : > { %v442_v49 = vmul.f32 0.5, %v434_v44  ;;  %v506_v44 = vmul.f32 %v504_v43, %v1484_v21 }
  0xe9   : > { %v450_v51 = vsub.f32 %v442_v49, %v336_v48  ;;  %v1598_v14 = vperm.slane %v506_v44, 2  ;;  %v465_v48 = vmax.f32 %v1539_v34, 0.0 }
  0xeb   : > { %v1569_v52 = vmul.f32 %v450_v51, %v393_v40 }
  0xed   : > { %v363_v31 = vpop.permute.xlu1 %362  ;;  %v466_v62 = vmax.f32 %v1569_v52, 0.0 }
  0xee   : > { %v379_v53 = vadd.f32 %v1497_v27, %v363_v31 }
  0xf0   : > { %v387_v55 = vmul.f32 0.5, %v379_v53 }
  0xf2   : > { %v395_v58 = vsub.f32 %v387_v55, %v289_v19 }
  0xf4   : > { %v1577_v39 = vmul.f32 %v452_v57, %v395_v58 }
  0xf6   : > { %v424_v40 = vpop.permute.xlu1 %423 }
  0xf7   : > { %v437_v59 = vadd.f32 %v1529_v60, %v424_v40  ;;  %v468_v40 = vmax.f32 %v1577_v39, 0.0 }
  0xf9   : > { %v445_v10 = vmul.f32 0.5, %v437_v59 }
  0xfb   : > { %v453_v16 = vsub.f32 %v445_v10, %v339_v9 }
  0xfd   : > { %v1585_v18 = vmul.f32 %v453_v16, %v396_v15 }
  0xfe   : > { %v428_v56 = vpop.permute.xlu1 %427 }
  0xff   : > { %v438_v26 = vadd.f32 %v1529_v60, %v428_v56  ;;  %v469_v59 = vmax.f32 %v1585_v18, 0.0 }
 0x101   : > { %v446_v30 = vmul.f32 0.5, %v438_v26 }
 0x103   : > { %v454_v36 = vsub.f32 %v446_v30, %v340_v28 }
 0x105   : > { %v1594_v27 = vmul.f32 %v454_v36, %v397_v33 }
 0x111   : > { %v520_v60 = vpop.permute.xlu2 %519 }
 0x112   : > { %v550_v22 = vadd.f32 %v1598_v14, %v520_v60 }
 0x114   : > { %v558_v24 = vsub.f32 %v550_v22, %v465_v48 }
 0x116   : > { %1236 = vrcp.f32 %v558_v24  ;;  %v605_v47 = vand.u32 2147483648, %v558_v24  ;;  %v603_v51 = vand.u32 2147483647, %v558_v24  ;;  %vm599_vm1 = vweird.f32 %v558_v24 }
 0x118   : > { %v606_v34 = vor.u32 1.1754944e-38, %v605_v47  ;;  %vm604_vm3 = vcmp.eq.f32.partialorder %v603_v51, 8.507059e+37 }
 0x11c   : > { %v1237_v25 = vpop.eup %1236 }
 0x11d   : > { %v595_v45 = vmul.f32 %v1237_v25, %v558_v24  ;;  %vm600_vm0 = vweird.f32 %v1237_v25 }
 0x11e   : > { %vm601_vm2 = vmor %vm599_vm1, %vm600_vm0 }
 0x11f   : > { %v596_v46 = vsub.f32 1.0, %v595_v45  ;;  %v1326_v45 = vmov 4  }
 0x120   : > { %1235 = vset.pattern.permute.xlu1 %v1326_v45  ;;  %1234 = vset.pattern.permute.xlu0 %v1326_v45 }
 0x121   : > { %v597_v49 = vmul.f32 %v1237_v25, %v596_v46  ;;  %1233 = vset.pattern.permute.xlu2 %v1326_v45 }
 0x122   : > { %v515_v35 = vpop.permute.xlu1 %514 }
 0x123   : > { %v549_v21 = vadd.f32 %v1598_v14, %v515_v35  ;;  %v598_v29 = vadd.f32 %v1237_v25, %v597_v49 }
 0x125   : > { %v557_v31 = vsub.f32 %v549_v21, %v464_v17  ;;  %v602_v32 = vsel %vm601_vm2, %v1237_v25, %v598_v29 }
 0x126   : > { %v607_v53 = vsel %vm604_vm3, %v606_v34, %v602_v32  ;;  %v467_v32 = vmax.f32 %v1554_v23, 0.0 }
 0x127   : > { %1238 = vrcp.f32 %v557_v31  ;;  %v1604_v19 = vmul.f32 %v607_v53, %v465_v48  ;;  %v588_v61 = vand.u32 2147483647, %v557_v31  ;;  %v590_v63 = vand.u32 2147483648, %v557_v31 }
 0x128   : > { %vm584_vm6 = vweird.f32 %v557_v31  ;;  %v463_v48 = vmax.f32 %v1562_v37, 0.0 }
 0x129   : > { %v525_v50 = vpop.permute.xlu2 %524  ;;  %v691_v54 = vsel %vm684_vm4, %v1604_v19, -inf  ;;  %v591_v12 = vor.u32 1.1754944e-38, %v590_v63  ;;  %vm589_vm8 = vcmp.eq.f32.partialorder %v588_v61, 8.507059e+37 }
 0x12a   : > { %v551_v55 = vadd.f32 %v1598_v14, %v525_v50  ;;  %692 = vmax.xlane.f32.xlu0 %v691_v54 }
 0x12c   : > { %v559_v57 = vsub.f32 %v551_v55, %v466_v62 }
 0x12d   : > { %v1239_v58 = vpop.eup %1238 }
 0x12e   : > { %1240 = vrcp.f32 %v559_v57  ;;  %v580_v38 = vmul.f32 %v1239_v58, %v557_v31  ;;  %vm585_vm5 = vweird.f32 %v1239_v58  ;;  %v620_v36 = vand.u32 2147483648, %v559_v57 }
 0x12f   : > { %vm586_vm7 = vmor %vm584_vm6, %vm585_vm5  ;;  %v618_v60 = vand.u32 2147483647, %v559_v57  ;;  %vm614_vm10 = vweird.f32 %v559_v57 }
 0x130   : > { %v581_v13 = vsub.f32 1.0, %v580_v38  ;;  %v621_v49 = vor.u32 1.1754944e-38, %v620_v36 }
 0x131   : > { %v535_v20 = vpop.permute.xlu1 %534  ;;  %v540_v41 = vpop.permute.xlu2 %539  ;;  %vm619_vm12 = vcmp.eq.f32.partialorder %v618_v60, 8.507059e+37 }
 0x132   : > { %v553_v9 = vadd.f32 %v1598_v14, %v535_v20  ;;  %v554_v52 = vadd.f32 %v1598_v14, %v540_v41  ;;  %v582_v10 = vmul.f32 %v1239_v58, %v581_v13 }
 0x134   : > { %v1241_v11 = vpop.eup %1240  ;;  %v1616_v15 = vsub.f32 %v553_v9, %v468_v40  ;;  %v1620_v16 = vsub.f32 %v554_v52, %v469_v59  ;;  %v583_v56 = vadd.f32 %v1239_v58, %v582_v10 }
 0x135   : > { %v610_v26 = vmul.f32 %v1241_v11, %v559_v57  ;;  %vm615_vm9 = vweird.f32 %v1241_v11 }
 0x136   : > { %1242 = vrcp.f32 %v1616_v15  ;;  %v587_v42 = vsel %vm586_vm7, %v1239_v58, %v583_v56  ;;  %vm616_vm11 = vmor %vm614_vm10, %vm615_vm9  ;;  %v665_v50 = vand.u32 2147483648, %v1620_v16  ;;  %v650_v54 = vand.u32 2147483648, %v1616_v15 }
 0x137   : > { %1244 = vrcp.f32 %v1620_v16  ;;  %v592_v28 = vsel %vm589_vm8, %v591_v12, %v587_v42  ;;  %v611_v30 = vsub.f32 1.0, %v610_v26  ;;  %v648_v38 = vand.u32 2147483647, %v1616_v15 }
 0x138   : > { %v1624_v33 = vmul.f32 %v592_v28, %v464_v17  ;;  %v663_v20 = vand.u32 2147483647, %v1620_v16  ;;  %vm644_vm15 = vweird.f32 %v1616_v15  ;;  %vm659_vm0 = vweird.f32 %v1620_v16 }
 0x139   : > { %v510_v43 = vpop.permute.xlu0 %509  ;;  %v612_v44 = vmul.f32 %v1241_v11, %v611_v30  ;;  %v651_v52 = vor.u32 1.1754944e-38, %v650_v54  ;;  %v666_v10 = vor.u32 1.1754944e-38, %v665_v50  ;;  %vm649_vm3 = vcmp.eq.f32.partialorder %v648_v38, 8.507059e+37 }
 0x13a   : > { %v548_v22 = vadd.f32 %v1598_v14, %v510_v43  ;;  %v688_v24 = vsel %vm684_vm4, %v1624_v33, -inf  ;;  %vm664_vm5 = vcmp.eq.f32.partialorder %v663_v20, 8.507059e+37 }
 0x13b   : > { %689 = vmax.xlane.f32.xlu2 %v688_v24  ;;  %v613_v25 = vadd.f32 %v1241_v11, %v612_v44 }
 0x13c   : > { %v1243_v46 = vpop.eup %1242  ;;  %v1632_v47 = vsub.f32 %v548_v22, %v463_v48  ;;  %v470_v22 = vmax.f32 %v1594_v27, 0.0 }
 0x13d   : > { %v1245_v51 = vpop.eup %1244  ;;  %v617_v35 = vsel %vm616_vm11, %v1241_v11, %v613_v25  ;;  %v640_v17 = vmul.f32 %v1243_v46, %v1616_v15  ;;  %vm645_vm13 = vweird.f32 %v1243_v46 }
 0x13e   : > { %1246 = vrcp.f32 %v1632_v47  ;;  %v622_v21 = vsel %vm619_vm12, %v621_v49, %v617_v35  ;;  %v655_v29 = vmul.f32 %v1245_v51, %v1620_v16  ;;  %vm660_vm14 = vweird.f32 %v1245_v51  ;;  %vm646_vm1 = vmor %vm644_vm15, %vm645_vm13 }
 0x13f   : > { %v1637_v34 = vmul.f32 %v622_v21, %v466_v62  ;;  %v641_v31 = vsub.f32 1.0, %v640_v17  ;;  %vm661_vm2 = vmor %vm659_vm0, %vm660_vm14  ;;  %v575_v30 = vand.u32 2147483648, %v1632_v47  ;;  %v573_v60 = vand.u32 2147483647, %v1632_v47 }
 0x140   : > { %v656_v53 = vsub.f32 1.0, %v655_v29  ;;  %vm569_vm7 = vweird.f32 %v1632_v47  ;;  %vm846_vm15 = vcmp.gt.f32.partialorder %v1420_v6, 0.0 }
 0x141   : > { %v530_v55 = vpop.permute.xlu0 %529  ;;  %v694_v57 = vsel %vm684_vm4, %v1637_v34, -inf  ;;  %v642_v58 = vmul.f32 %v1243_v46, %v641_v31  ;;  %v576_v25 = vor.u32 1.1754944e-38, %v575_v30  ;;  %vm574_vm9 = vcmp.eq.f32.partialorder %v573_v60, 8.507059e+37 }
 0x142   : > { %v552_v13 = vadd.f32 %v1598_v14, %v530_v55  ;;  %v657_v62 = vmul.f32 %v1245_v51, %v656_v53 }
 0x143   : > { %695 = vmax.xlane.f32.xlu2 %v694_v57  ;;  %v643_v41 = vadd.f32 %v1243_v46, %v642_v58 }
 0x144   : > { %v1247_v61 = vpop.eup %1246  ;;  %v560_v63 = vsub.f32 %v552_v13, %v467_v32  ;;  %v658_v9 = vadd.f32 %v1245_v51, %v657_v62  ;;  %v862_v62 = vsel %vm846_vm15, 1, %v1321_v0 }
 0x145   : > { %v647_v11 = vsel %vm646_vm1, %v1243_v46, %v643_v41  ;;  %v565_v56 = vmul.f32 %v1247_v61, %v1632_v47  ;;  %vm570_vm6 = vweird.f32 %v1247_v61 }
 0x146   : > { %1248 = vrcp.f32 %v560_v63  ;;  %v662_v12 = vsel %vm661_vm2, %v1245_v51, %v658_v9  ;;  %v652_v26 = vsel %vm649_vm3, %v651_v52, %v647_v11  ;;  %vm571_vm8 = vmor %vm569_vm7, %vm570_vm6  ;;  %v635_v51 = vand.u32 2147483648, %v560_v63 }
 0x147   : > { %v667_v15 = vsel %vm664_vm5, %v666_v10, %v662_v12  ;;  %v1654_v42 = vmul.f32 %v652_v26, %v468_v40  ;;  %v566_v28 = vsub.f32 1.0, %v565_v56  ;;  %v633_v47 = vand.u32 2147483647, %v560_v63 }
 0x148   : > { %v1658_v16 = vmul.f32 %v667_v15, %v469_v59  ;;  %vm629_vm11 = vweird.f32 %v560_v63  ;;  %v636_v31 = vor.u32 1.1754944e-38, %v635_v51  ;;  %vm847_vm3 = vcmp.gt.f32.partialorder %v1409_v2, 0.0 }
 0x149   : > { %v545_v36 = vpop.permute.xlu0 %544  ;;  %v700_v43 = vsel %vm684_vm4, %v1654_v42, -inf  ;;  %v567_v44 = vmul.f32 %v1247_v61, %v566_v28  ;;  %vm634_vm13 = vcmp.eq.f32.partialorder %v633_v47, 8.507059e+37  ;;  %vm848_vm5 = vcmp.gt.f32.partialorder %v1418_v5, 0.0 }
 0x14a   : > { %v555_v39 = vadd.f32 %v1598_v14, %v545_v36  ;;  %v703_v40 = vsel %vm684_vm4, %v1658_v16, -inf  ;;  %v864_v6 = vsel %vm848_vm5, 1, %v1321_v0  ;;  %vm845_vm6 = vcmp.gt.f32.partialorder %v1413_v3, 0.0 }
 0x14b   : > { %704 = vmax.xlane.f32.xlu0 %v703_v40  ;;  %701 = vmax.xlane.f32.xlu2 %v700_v43  ;;  %v568_v18 = vadd.f32 %v1247_v61, %v567_v44  ;;  %v208_v9 = vlaneseq }
 0x14c   : > { %v1249_v59 = vpop.eup %1248  ;;  %v563_v24 = vsub.f32 %v555_v39, %v470_v22 }
 0x14d   : > { %v572_v45 = vsel %vm571_vm8, %v1247_v61, %v568_v18  ;;  %v625_v46 = vmul.f32 %v1249_v59, %v560_v63  ;;  %vm630_vm10 = vweird.f32 %v1249_v59  ;;  %v863_v61 = vsel %vm847_vm3, 1, %v1321_v0 }
 0x14e   : > { %1250 = vrcp.f32 %v563_v24  ;;  %v577_v49 = vsel %vm574_vm9, %v576_v25, %v572_v45  ;;  %vm631_vm12 = vmor %vm629_vm11, %vm630_vm10  ;;  %v680_v55 = vand.u32 2147483648, %v563_v24  ;;  %v678_v38 = vand.u32 2147483647, %v563_v24 }
 0x14f   : > { %v1671_v27 = vmul.f32 %v577_v49, %v463_v48  ;;  %v626_v14 = vsub.f32 1.0, %v625_v46  ;;  %vm674_vm0 = vweird.f32 %v563_v24  ;;  %v861_v63 = vsel %vm845_vm6, 1, %v1321_v0 }
 0x150   : > { %v681_v20 = vor.u32 1.1754944e-38, %v680_v55  ;;  %vm679_vm2 = vcmp.eq.f32.partialorder %v678_v38, 8.507059e+37  ;;  %v1692_v52 = vand.u32 127, %v208_v9  ;;  %vm850_vm6 = vcmp.gt.f32.partialorder %v1416_v4, 0.0 }
 0x151   : > { %v685_v35 = vsel %vm684_vm4, %v1671_v27, -inf  ;;  %v627_v17 = vmul.f32 %v1249_v59, %v626_v14 }
 0x152   : > { %686 = vmax.xlane.f32.xlu1 %v685_v35 }
 0x153   : > { %v628_v21 = vadd.f32 %v1249_v59, %v627_v17 }
 0x154   : > { %v1251_v29 = vpop.eup %1250 }
 0x155   : > { %v632_v53 = vsel %vm631_vm12, %v1249_v59, %v628_v21  ;;  %v670_v50 = vmul.f32 %v1251_v29, %v563_v24  ;;  %vm675_vm14 = vweird.f32 %v1251_v29 }
 0x156   : > { %v637_v37 = vsel %vm634_vm13, %v636_v31, %v632_v53  ;;  %vm676_vm1 = vmor %vm674_vm0, %vm675_vm14  ;;  %vm849_vm14 = vcmp.gt.f32.partialorder %v1407_v1, 0.0 }
 0x157   : > { %v1677_v48 = vmul.f32 %v637_v37, %v467_v32  ;;  %v671_v54 = vsub.f32 1.0, %v670_v50  ;;  %v865_v21 = vsel %vm849_vm14, 1, %v1321_v0 }
 0x159   : > { %v697_v57 = vsel %vm684_vm4, %v1677_v48, -inf  ;;  %v672_v58 = vmul.f32 %v1251_v29, %v671_v54 }
 0x15a   : > { %698 = vmax.xlane.f32.xlu1 %v697_v57 }
 0x15b   : > { %v673_v13 = vadd.f32 %v1251_v29, %v672_v58 }
 0x15d   : > { %v677_v23 = vsel %vm676_vm1, %v1251_v29, %v673_v13 }
 0x15e   : > { %v682_v32 = vsel %vm679_vm2, %v681_v20, %v677_v23 }
 0x15f   : > { %873 = vperm.xlu0 %1234, %v862_v62   ;;  %v1683_v41 = vmul.f32 %v682_v32, %v470_v22 }
 0x161   : > { %v706_v5 = vsel %vm684_vm4, %v1683_v41, -inf }
 0x163   : > { %870 = vperm.xlu2 %1233, %v861_v63  }
 0x173   : > { %876 = vperm.xlu1 %1235, %v863_v61  }
 0x17b   : > { %879 = vperm.xlu1 %1235, %v864_v6  }
 0x19d   : > { %v693_v10 = vpop.xlane.xlu0 %692 }
 0x19e   : > { %vm711_vm7 = vcmp.eq.f32.partialorder %v1604_v19, %v693_v10 }
 0x19f   : > { %v719_v2 = vsel %vm711_vm7, %v1692_v52, 64 }
 0x1a0   : > { %v1697_v11 = vsel %vm684_vm4, %v719_v2, 2147483647 }
 0x1a1   : > { %v757_v3 = vshra.s32 %v1697_v11, 16  ;;  %v756_v57 = vand.u32 65535, %v1697_v11 }
 0x1a3   : > { %v1702_v56 = vcvt.s32.f32 %v757_v3  ;;  %v758_v58 = vcvt.s32.f32 %v756_v57 }
 0x1a5   : > { %707 = vmax.xlane.f32.xlu1 %v706_v5 }
 0x1ad   : > { %760 = vmin.xlane.f32.xlu1 %v1702_v56 }
 0x1ae   : > { %v690_v12 = vpop.xlane.xlu2 %689 }
 0x1af   : > { %vm710_vm8 = vcmp.eq.f32.partialorder %v1624_v33, %v690_v12 }
 0x1b0   : > { %v718_v19 = vsel %vm710_vm8, %v1692_v52, 64 }
 0x1b1   : > { %v740_v26 = vsel %vm684_vm4, %v718_v19, 2147483647 }
 0x1b2   : > { %v742_v15 = vshra.s32 %v740_v26, 16  ;;  %v741_v38 = vand.u32 65535, %v740_v26 }
 0x1b4   : > { %v744_v28 = vcvt.s32.f32 %v742_v15  ;;  %v743_v20 = vcvt.s32.f32 %v741_v38 }
 0x1b6   : > { %745 = vmin.xlane.f32.xlu0 %v744_v28  ;;  %v696_v30 = vpop.xlane.xlu2 %695 }
 0x1b7   : > { %vm712_vm10 = vcmp.eq.f32.partialorder %v1637_v34, %v696_v30 }
 0x1b8   : > { %v720_v18 = vsel %vm712_vm10, %v1692_v52, 64  ;;  %vm851_vm10 = vcmp.gt.f32.partialorder %v1427_v8, 0.0 }
 0x1b9   : > { %v770_v25 = vsel %vm684_vm4, %v720_v18, 2147483647  ;;  %v867_v4 = vsel %vm851_vm10, 1, %v1321_v0 }
 0x1ba   : > { %v772_v46 = vshra.s32 %v770_v25, 16  ;;  %v771_v3 = vand.u32 65535, %v770_v25 }
 0x1bc   : > { %v774_v51 = vcvt.s32.f32 %v772_v46  ;;  %v773_v12 = vcvt.s32.f32 %v771_v3  ;;  %v1327_v46 = vmov 0.0  }
 0x1be   : > { %v702_v36 = vpop.xlane.xlu2 %701 }
 0x1bf   : > { %vm714_vm9 = vcmp.eq.f32.partialorder %v1654_v42, %v702_v36  ;;  %v705_v42 = vpop.xlane.xlu0 %704 }
 0x1c0   : > { %v722_v43 = vsel %vm714_vm9, %v1692_v52, 64  ;;  %vm715_vm12 = vcmp.eq.f32.partialorder %v1658_v16, %v705_v42  ;;  %vm852_vm9 = vcmp.gt.f32.partialorder %v1425_v7, 0.0 }
 0x1c1   : > { %v800_v44 = vsel %vm684_vm4, %v722_v43, 2147483647 }
 0x1c2   : > { %v802_v60 = vshra.s32 %v800_v44, 16  ;;  %v801_v32 = vand.u32 65535, %v800_v44  ;;  %v866_v44 = vsel %vm850_vm6, 1, %v1321_v0 }
 0x1c4   : > { %v804_v22 = vcvt.s32.f32 %v802_v60  ;;  %v803_v6 = vcvt.s32.f32 %v801_v32 }
 0x1c5   : > { %v687_v39 = vpop.xlane.xlu1 %686 }
 0x1c6   : > { %805 = vmin.xlane.f32.xlu1 %v804_v22  ;;  %vm709_vm11 = vcmp.eq.f32.partialorder %v1671_v27, %v687_v39  ;;  %v723_v27 = vsel %vm715_vm12, %v1692_v52, 64  ;;  %v868_v39 = vsel %vm852_vm9, 1, %v1321_v0 }
 0x1c7   : > { %v717_v33 = vsel %vm709_vm11, %v1692_v52, 64  ;;  %v815_v17 = vsel %vm684_vm4, %v723_v27, 2147483647 }
 0x1c8   : > { %v725_v40 = vsel %vm684_vm4, %v717_v33, 2147483647  ;;  %v817_v47 = vshra.s32 %v815_v17, 16 }
 0x1c9   : > { %v727_v59 = vshra.s32 %v725_v40, 16  ;;  %v726_v10 = vand.u32 65535, %v725_v40 }
 0x1ca   : > { %v819_v16 = vcvt.s32.f32 %v817_v47 }
 0x1cb   : > { %v729_v24 = vcvt.s32.f32 %v727_v59  ;;  %v728_v11 = vcvt.s32.f32 %v726_v10 }
 0x1cd   : > { %730 = vmin.xlane.f32.xlu2 %v729_v24  ;;  %v699_v45 = vpop.xlane.xlu1 %698 }
 0x1ce   : > { %vm713_vm13 = vcmp.eq.f32.partialorder %v1677_v48, %v699_v45 }
 0x1cf   : > { %v721_v34 = vsel %vm713_vm13, %v1692_v52, 64 }
 0x1d0   : > { %v785_v49 = vsel %vm684_vm4, %v721_v34, 2147483647 }
 0x1d1   : > { %v787_v14 = vshra.s32 %v785_v49, 16  ;;  %v1732_v55 = vpop.permute.xlu0 %873  ;;  %v786_v15 = vand.u32 65535, %v785_v49 }
 0x1d3   : > { %v789_v35 = vcvt.s32.f32 %v787_v14  ;;  %v788_v36 = vcvt.s32.f32 %v786_v15 }
 0x1d5   : > { %775 = vmin.xlane.f32.xlu2 %v774_v51  ;;  %790 = vmin.xlane.f32.xlu0 %v789_v35 }
 0x1dd   : > { %820 = vmin.xlane.f32.xlu2 %v819_v16 }
 0x1df   : > { %882 = vperm.xlu1 %1235, %v865_v21  }
 0x1e5   : > { %v1725_v29 = vpop.permute.xlu1 %876 }
 0x1e6   : > { %vm895_vm12 = vcmp.eq.s32.totalorder %v1725_v29, 1 }
 0x1ed   : > { %v1727_v31 = vpop.permute.xlu1 %879 }
 0x1ee   : > { %vm896_vm6 = vcmp.eq.s32.totalorder %v1727_v31, 1 }
 0x218   : > { %v708_v53 = vpop.xlane.xlu1 %707 }
 0x219   : > { %vm716_vm15 = vcmp.eq.f32.partialorder %v1683_v41, %v708_v53  ;;  %v1736_v41 = vpop.permute.xlu2 %870 }
 0x21a   : > { %v724_v50 = vsel %vm716_vm15, %v1692_v52, 64  ;;  %vm894_vm15 = vcmp.eq.s32.totalorder %v1732_v55, 1 }
 0x21b   : > { %v830_v37 = vsel %vm684_vm4, %v724_v50, 2147483647 }
 0x21c   : > { %v832_v48 = vshra.s32 %v830_v37, 16  ;;  %v831_v33 = vand.u32 65535, %v830_v37 }
 0x21e   : > { %v834_v54 = vcvt.s32.f32 %v832_v48  ;;  %v833_v18 = vcvt.s32.f32 %v831_v33 }
 0x220   : > { %835 = vmin.xlane.f32.xlu0 %v834_v54  ;;  %v761_v1 = vpop.xlane.xlu1 %760 }
 0x221   : > { %vm762_vm0 = vcmp.eq.f32.partialorder %v1702_v56, %v761_v1  ;;  %v767_v42 = vcvt.f32.s32 %v761_v1 }
 0x222   : > { %v763_v13 = vsel %vm762_vm0, %v758_v58, inf }
 0x223   : > { %v768_v25 = vshll.u32 %v767_v42, 16 }
 0x228   : > { %764 = vmin.xlane.f32.xlu0 %v763_v13 }
 0x229   : > { %v746_v62 = vpop.xlane.xlu0 %745 }
 0x22a   : > { %vm747_vm1 = vcmp.eq.f32.partialorder %v744_v28, %v746_v62  ;;  %v816_v28 = vand.u32 65535, %v815_v17  ;;  %v752_v7 = vcvt.f32.s32 %v746_v62 }
 0x22b   : > { %v748_v23 = vsel %vm747_vm1, %v743_v20, inf }
 0x22c   : > { %749 = vmin.xlane.f32.xlu2 %v748_v23  ;;  %v818_v43 = vcvt.s32.f32 %v816_v28  ;;  %v753_v49 = vshll.u32 %v752_v7, 16 }
 0x239   : > { %v1738_v61 = vpop.xlane.xlu1 %805 }
 0x23a   : > { %vm807_vm2 = vcmp.eq.f32.partialorder %v804_v22, %v1738_v61  ;;  %v812_v58 = vcvt.f32.s32 %v1738_v61 }
 0x23b   : > { %v808_v63 = vsel %vm807_vm2, %v803_v6, inf  ;;  %vm893_vm2 = vcmp.eq.s32.totalorder %v1736_v41, 1 }
 0x23c   : > { %809 = vmin.xlane.f32.xlu2 %v808_v63  ;;  %v813_v6 = vshll.u32 %v812_v58, 16 }
 0x240   : > { %v731_v2 = vpop.xlane.xlu2 %730 }
 0x241   : > { %vm732_vm3 = vcmp.eq.f32.partialorder %v729_v24, %v731_v2  ;;  %v737_v17 = vcvt.f32.s32 %v731_v2 }
 0x242   : > { %v733_v5 = vsel %vm732_vm3, %v728_v11, inf }
 0x243   : > { %734 = vmin.xlane.f32.xlu1 %v733_v5 }
 0x248   : > { %v1741_v56 = vpop.xlane.xlu2 %775  ;;  %v1744_v26 = vpop.xlane.xlu0 %790 }
 0x249   : > { %vm777_vm5 = vcmp.eq.f32.partialorder %v774_v51, %v1741_v56  ;;  %vm792_vm7 = vcmp.eq.f32.partialorder %v789_v35, %v1744_v26  ;;  %v782_v50 = vcvt.f32.s32 %v1741_v56  ;;  %v797_v63 = vcvt.f32.s32 %v1744_v26 }
 0x24a   : > { %v778_v19 = vsel %vm777_vm5, %v773_v12, inf  ;;  %v793_v60 = vsel %vm792_vm7, %v788_v36, inf }
 0x24b   : > { %779 = vmin.xlane.f32.xlu1 %v778_v19  ;;  %v783_v38 = vshll.u32 %v782_v50, 16  ;;  %v798_v3 = vshll.u32 %v797_v63, 16 }
 0x250   : > { %v1748_v30 = vpop.xlane.xlu2 %820 }
 0x251   : > { %vm822_vm8 = vcmp.eq.f32.partialorder %v819_v16, %v1748_v30  ;;  %v883_v35 = vpop.permute.xlu1 %882  ;;  %v738_v16 = vshll.u32 %v737_v17, 16 }
 0x252   : > { %v823_v22 = vsel %vm822_vm8, %v818_v43, inf }
 0x253   : > { %794 = vmin.xlane.f32.xlu1 %v793_v60  ;;  %824 = vmin.xlane.f32.xlu0 %v823_v22  ;;  %v1801_v60 = vld [vmem:[%s1477_s6] sm:$0xff]  ;;  %v1805_v22 = vshrl.u32 %v208_v9, 7 }
 0x254   : > { %885 = vperm.xlu2 %1233, %v866_v44   ;;  %v1798_v44 = vld [vmem:[%s202_s9] sm:$0xff]  ;;  %1252 = vrsqrt.f32 %v1801_v60 }
 0x255   : > { %1254 = vrsqrt.f32 %v1798_v44 }
 0x25c   : > { %891 = vperm.xlu2 %1233, %v868_v39   ;;  %v220_v39 = vld [vmem:[%s1477_s6 + $0x8] sm:$0xff] }
 0x267   : > { %888 = vperm.xlu0 %1234, %v867_v4   ;;  %v224_v4 = vld [vmem:[%s202_s9 + $0x8] sm:$0xff] }
 0x293   : > { %v1756_v40 = vpop.xlane.xlu0 %835 }
 0x294   : > { %vm837_vm11 = vcmp.eq.f32.partialorder %v834_v54, %v1756_v40 }
 0x295   : > { %v838_v59 = vsel %vm837_vm11, %v833_v18, inf  ;;  %v212_v18 = vadd.s32 8, %v1805_v22 }
 0x296   : > { %839 = vmin.xlane.f32.xlu1 %v838_v59  ;;  %v996_v59 = vsub.f32 %v220_v39, %v224_v4 }
 0x298   : > { %v999_v7 = vmul.f32 %v996_v59, %v996_v59 }
 0x29b   : > { %v765_v24 = vpop.xlane.xlu0 %764 }
 0x29c   : > { %v766_v45 = vcvt.f32.s32 %v765_v24  ;;  %v221_v24 = vld [vmem:[%s1477_s6 + $0x10] sm:$0xff] }
 0x29e   : > { %v769_v34 = vadd.s32 %v768_v25, %v766_v45  ;;  %1014 = vadd.xlane.f32.xlu1 %v1327_v46  ;;  %v225_v25 = vld [vmem:[%s202_s9 + $0x10] sm:$0xff] }
 0x29f   : > { %v750_v8 = vpop.xlane.xlu2 %749  ;;  %v997_v45 = vsub.f32 %v221_v24, %v225_v25  ;;  %v938_v24 = vsub.f32 %v1801_v60, %v1798_v44 }
 0x2a0   : > { %vm855_vm13 = vcmp.eq.s32.totalorder %v769_v34, %v1692_v52  ;;  %v751_v27 = vcvt.f32.s32 %v750_v8  ;;  %v222_v34 = vld [vmem:[%s1477_s6 + $0x18] sm:$0x3f] }
 0x2a1   : > { %vm1762_vm14 = vmand %vm855_vm13, %vm895_vm12  ;;  %vm897_vm12 = vcmp.eq.s32.totalorder %v883_v35, 1  ;;  %v226_v8 = vld [vmem:[%s202_s9 + $0x18] sm:$0x3f] }
 0x2a2   : > { %v754_v51 = vadd.s32 %v753_v49, %v751_v27  ;;  %v911_v48 = vsel %vm1762_vm14, 1.0, %v1327_v46  ;;  %v1253_v49 = vpop.eup %1252 }
 0x2a3   : > { %v920_v20 = vsel %vm684_vm4, %v911_v48, 0.0  ;;  %v1255_v27 = vpop.eup %1254 }
 0x2a4   : > { %vm854_vm0 = vcmp.eq.s32.totalorder %v754_v51, %v1692_v52  ;;  %v1000_v51 = vmul.f32 %v997_v45, %v997_v45  ;;  %v939_v45 = vmul.f32 %v938_v24, %v938_v24 }
 0x2a5   : > { %vm902_vm1 = vmand %vm854_vm0, %vm894_vm15  ;;  %vm991_vm15 = vcmp.gt.f32.partialorder %v1798_v44, 0.0  ;;  %vm216_vm0 = vcmp.ge.s32.totalorder %v212_v18, 10 }
 0x2a6   : > { %v910_v37 = vsel %vm902_vm1, 1.0, %v1327_v46  ;;  %v1002_v33 = vsel %vm991_vm15, 1, %v1321_v0  ;;  %v998_v0 = vsub.f32 %v222_v34, %v226_v8 }
 0x2a7   : > { %v918_v55 = vsel %vm684_vm4, %v910_v37, 0.0  ;;  %v1003_v42 = vperm.slane %v1002_v33, 4 }
 0x2a8   : > { %v1001_v17 = vmul.f32 %v998_v0, %v998_v0 }
 0x2a9   : > { %vm1815_vm1 = vcmp.eq.s32.totalorder %v1003_v42, 1 }
 0x2af   : > { %v810_v53 = vpop.xlane.xlu2 %809 }
 0x2b0   : > { %v811_v23 = vcvt.f32.s32 %v810_v53  ;;  %v957_v53 = vmul.f32 %v1255_v27, %v1798_v44 }
 0x2b2   : > { %v814_v2 = vadd.s32 %v813_v6, %v811_v23  ;;  %v958_v48 = vmul.f32 %v1255_v27, %v957_v53  ;;  %v842_v6 = vcvt.f32.s32 %v1756_v40  ;;  %v966_v40 = vand.u32 2147483648, %v1798_v44 }
 0x2b4   : > { %vm858_vm10 = vcmp.eq.s32.totalorder %v814_v2, %v1692_v52 }
 0x2b6   : > { %v735_v47 = vpop.xlane.xlu1 %734 }
 0x2b7   : > { %v736_v21 = vcvt.f32.s32 %v735_v47  ;;  %v886_v10 = vpop.permute.xlu2 %885  ;;  %v1011_v47 = vsel %vm1815_vm1, %v1000_v51, 0.0 }
 0x2b8   : > { %vm898_vm9 = vcmp.eq.s32.totalorder %v886_v10, 1  ;;  %v843_v10 = vshll.u32 %v842_v6, 16 }
 0x2b9   : > { %v739_v29 = vadd.s32 %v738_v16, %v736_v21  ;;  %vm906_vm11 = vmand %vm858_vm10, %vm898_vm9  ;;  %v945_v16 = vmul.f32 %v1801_v60, %v1253_v49  ;;  %v1019_v21 = vsel %vm684_vm4, %v1011_v47, 0.0  ;;  %vm963_vm9 = vcmp.eq.f32.partialorder %v1798_v44, inf }
 0x2ba   : > { %v914_v19 = vsel %vm906_vm11, 1.0, %v1327_v46  ;;  %1020 = vadd.xlane.f32.xlu1 %v1019_v21  ;;  %vm953_vm10 = vcmp.eq.f32.partialorder %v1801_v60, 0.0  ;;  %vm965_vm11 = vcmp.eq.f32.partialorder %v1798_v44, 0.0 }
 0x2bb   : > { %vm853_vm3 = vcmp.eq.s32.totalorder %v739_v29, %v1692_v52  ;;  %v926_v36 = vsel %vm684_vm4, %v914_v19, 0.0  ;;  %v1012_v29 = vsel %vm1815_vm1, %v1001_v17, 0.0  ;;  %v946_v37 = vmul.f32 %v1253_v49, %v945_v16 }
 0x2bc   : > { %vm901_vm5 = vmand %vm853_vm3, %vm893_vm2  ;;  %vm1022_vm3 = vcmask 521216   ;;  %v992_v16 = vsel %vm991_vm15, %v939_v45, 0.0  ;;  %vm1045_vm15 = vcmp.eq.s32.totalorder %v1692_v52, 2 }
 0x2bd   : > { %v909_v54 = vsel %vm901_vm5, 1.0, %v1327_v46  ;;  %vm1006_vm2 = vmand %vm216_vm0, %vm1815_vm1  ;;  %v1023_v50 = vsel %vm1022_vm3, %v1012_v29, 0.0  ;;  %vm980_vm0 = vcmask 518146   ;;  %vm1028_vm3 = vcmask 1045504  }
 0x2be   : > { %v917_v1 = vsel %vm684_vm4, %v909_v54, 0.0  ;;  %v780_v57 = vpop.xlane.xlu1 %779  ;;  %v1010_v14 = vsel %vm1006_vm2, %v999_v7, 0.0  ;;  %1024 = vadd.xlane.f32.xlu0 %v1023_v50  ;;  %vm987_vm2 = vcmask 520196  }
 0x2bf   : > { %v919_v13 = vadd.f32 %v918_v55, %v917_v1  ;;  %v781_v62 = vcvt.f32.s32 %v780_v57  ;;  %v1016_v35 = vsel %vm684_vm4, %v1010_v14, 0.0  ;;  %v947_v55 = vmul.f32 0.5, %v946_v37 }
 0x2c0   : > { %1017 = vadd.xlane.f32.xlu2 %v1016_v35  ;;  %v959_v1 = vmul.f32 0.5, %v958_v48  ;;  %v827_v57 = vcvt.f32.s32 %v1748_v30  ;;  %v985_v35 = vmul.f32 %v1801_v60, %v1801_v60  ;;  %v993_v21 = vsel %vm987_vm2, %v992_v16, 0.0 }
 0x2c1   : > { %v921_v32 = vadd.f32 %v920_v20, %v919_v13  ;;  %v784_v41 = vadd.s32 %v783_v38, %v781_v62  ;;  %v948_v38 = vsub.f32 1.5, %v947_v55 }
 0x2c2   : > { %v960_v13 = vsub.f32 1.5, %v959_v1  ;;  %v828_v62 = vshll.u32 %v827_v57, 16 }
 0x2c3   : > { %vm856_vm7 = vcmp.eq.s32.totalorder %v784_v41, %v1692_v52 }
 0x2c4   : > { %vm904_vm8 = vmand %vm856_vm7, %vm896_vm6  ;;  %v961_v41 = vmul.f32 %v1255_v27, %v960_v13 }
 0x2c5   : > { %v912_v61 = vsel %vm904_vm8, 1.0, %v1327_v46  ;;  %vm951_vm8 = vcmp.eq.f32.partialorder %v1801_v60, inf }
 0x2c6   : > { %v922_v11 = vsel %vm684_vm4, %v912_v61, 0.0  ;;  %v795_v5 = vpop.xlane.xlu1 %794  ;;  %v825_v54 = vpop.xlane.xlu0 %824  ;;  %v962_v30 = vmul.f32 %v961_v41, %v1798_v44 }
 0x2c7   : > { %v923_v56 = vadd.f32 %v922_v11, %v921_v32  ;;  %v796_v12 = vcvt.f32.s32 %v795_v5  ;;  %v826_v58 = vcvt.f32.s32 %v825_v54  ;;  %v949_v32 = vmul.f32 %v1253_v49, %v948_v38 }
 0x2c8   : > { %v954_v5 = vand.u32 2147483648, %v1801_v60 }
 0x2c9   : > { %v799_v31 = vadd.s32 %v798_v3, %v796_v12  ;;  %v829_v23 = vadd.s32 %v828_v62, %v826_v58  ;;  %v950_v63 = vmul.f32 %v1801_v60, %v949_v32  ;;  %v892_v12 = vpop.permute.xlu2 %891 }
 0x2cb   : > { %vm857_vm13 = vcmp.eq.s32.totalorder %v799_v31, %v1692_v52  ;;  %vm859_vm6 = vcmp.eq.s32.totalorder %v829_v23, %v1692_v52  ;;  %v952_v11 = vsel %vm951_vm8, %v1801_v60, %v950_v63  ;;  %vm1057_vm8 = vcmp.eq.s32.totalorder %v1692_v52, 4 }
 0x2cc   : > { %vm905_vm14 = vmand %vm857_vm13, %vm897_vm12  ;;  %vm900_vm12 = vcmp.eq.s32.totalorder %v892_v12, 1 }
 0x2cd   : > { %v913_v26 = vsel %vm905_vm14, 1.0, %v1327_v46 }
 0x2ce   : > { %v924_v15 = vsel %vm684_vm4, %v913_v26, 0.0  ;;  %v955_v26 = vsel %vm953_vm10, %v954_v5, %v952_v11 }
 0x2cf   : > { %v925_v28 = vadd.f32 %v924_v15, %v923_v56  ;;  %v964_v56 = vsel %vm963_vm9, %v1798_v44, %v962_v30  ;;  %vm1060_vm9 = vcmp.eq.s32.totalorder %v1805_v22, 0 }
 0x2d0   : > { %v967_v15 = vsel %vm965_vm11, %v966_v40, %v964_v56 }
 0x2d1   : > { %v1791_v43 = vadd.f32 %v926_v36, %v925_v28  ;;  %v968_v39 = vsub.f32 %v955_v26, %v967_v15 }
 0x2d3   : > { %v969_v59 = vmul.f32 %v968_v39, %v968_v39 }
 0x2d5   : > { %v971_v7 = vrot.slane %v969_v59, 1 }
 0x2d7   : > { %v973_v8 = vadd.f32 %v971_v7, %v969_v59 }
 0x2d9   : > { %v889_v20 = vpop.permute.xlu0 %888 }
 0x2da   : > { %vm899_vm5 = vcmp.eq.s32.totalorder %v889_v20, 1 }
 0x2db   : > { %vm907_vm7 = vmand %vm859_vm6, %vm899_vm5  ;;  %vm1039_vm5 = vcmp.eq.s32.totalorder %v1692_v52, 1  ;;  %vm1037_vm6 = vcmp.eq.s32.totalorder %v1692_v52, 0 }
 0x2dc   : > { %v915_v2 = vsel %vm907_vm7, 1.0, %v1327_v46  ;;  %vm1051_vm7 = vcmp.eq.s32.totalorder %v1692_v52, 3 }
 0x2dd   : > { %v928_v19 = vsel %vm684_vm4, %v915_v2, 0.0 }
 0x2de   : > { %v929_v28 = vadd.f32 %v928_v19, %v1791_v43  ;;  %v941_v43 = vrot.slane %v939_v45, 1 }
 0x2e0   : > { %v943_v27 = vadd.f32 %v941_v43, %v939_v45 }
 0x309   : > { %v840_v61 = vpop.xlane.xlu1 %839 }
 0x30a   : > { %v841_v3 = vcvt.f32.s32 %v840_v61 }
 0x30c   : > { %v844_v31 = vadd.s32 %v843_v10, %v841_v3 }
 0x30e   : > { %vm860_vm13 = vcmp.eq.s32.totalorder %v844_v31, %v1692_v52 }
 0x30f   : > { %vm908_vm14 = vmand %vm860_vm13, %vm900_vm12 }
 0x310   : > { %v916_v36 = vsel %vm908_vm14, 1.0, %v1327_v46 }
 0x311   : > { %v930_v4 = vsel %vm684_vm4, %v916_v36, 0.0  ;;  %vm975_vm4 = vcmask 516096   ;;  %v1015_v29 = vpop.xlane.xlu1 %1014 }
 0x312   : > { %v931_v33 = vadd.f32 %v930_v4, %v929_v28 }
 0x314   : > { %v932_v18 = vrot.slane %v931_v33, 4 }
 0x316   : > { %v933_v42 = vadd.f32 %v932_v18, %v931_v33 }
 0x318   : > { %v934_v25 = vrot.slane %v933_v42, 2 }
 0x31a   : > { %v935_v9 = vadd.f32 %v934_v25, %v933_v42 }
 0x31c   : > { %v936_v34 = vrot.slane %v935_v9, 1 }
 0x31e   : > { %v937_v49 = vadd.f32 %v936_v34, %v935_v9 }
 0x320   : > { %v979_v46 = vmul.f32 %v973_v8, %v937_v49  ;;  %v974_v14 = vmul.f32 %v943_v27, %v937_v49  ;;  %vm984_vm1 = vcmp.gt.f32.partialorder %v937_v49, 0.0 }
 0x321   : > { %v986_v17 = vsel %vm984_vm1, 0.0, %v985_v35 }
 0x322   : > { %v981_v0 = vsel %vm980_vm0, %v979_v46, 0.0  ;;  %v976_v51 = vsel %vm975_vm4, %v974_v14, 0.0  ;;  %v988_v47 = vsel %vm987_vm2, %v986_v17, 0.0 }
 0x323   : > { %982 = vadd.xlane.f32.xlu1 %v981_v0 }
 0x32b   : > { %977 = vadd.xlane.f32.xlu1 %v976_v51 }
 0x32d   : > { %v1021_v50 = vpop.xlane.xlu1 %1020 }
 0x331   : > { %v1025_v48 = vpop.xlane.xlu0 %1024 }
 0x332   : > { %v1029_v55 = vsel %vm1028_vm3, %v1025_v48, 0.0 }
 0x333   : > { %989 = vadd.xlane.f32.xlu1 %v988_v47  ;;  %v1018_v53 = vpop.xlane.xlu2 %1017 }
 0x334   : > { %v1026_v37 = vadd.f32 %v1018_v53, %v1015_v29 }
 0x336   : > { %v1027_v54 = vadd.f32 %v1026_v37, %v1021_v50 }
 0x338   : > { %v1030_v60 = vadd.f32 %v1029_v55, %v1027_v54 }
 0x33a   : > { %v1031_v57 = vrot.slane %v1030_v60, 4 }
 0x33b   : > { %994 = vadd.xlane.f32.xlu1 %v993_v21 }
 0x33c   : > { %v1032_v38 = vadd.f32 %v1031_v57, %v1030_v60 }
 0x33e   : > { %v1033_v13 = vrot.slane %v1032_v38, 2 }
 0x340   : > { %v1034_v62 = vadd.f32 %v1033_v13, %v1032_v38 }
 0x342   : > { %v1035_v32 = vrot.slane %v1034_v62, 1 }
 0x344   : > { %v1036_v2 = vadd.f32 %v1035_v32, %v1034_v62 }
 0x346   : > { %v1058_v3 = vsel %vm1057_vm8, %v1036_v2, 0.0 }
 0x396   : > { %v983_v1 = vpop.xlane.xlu1 %982 }
 0x397   : > { %v1040_v20 = vsel %vm1039_vm5, %v983_v1, 0.0 }
 0x398   : > { %v1042_v6 = vrot.slane %v1040_v20, 2 }
 0x39e   : > { %v978_v58 = vpop.xlane.xlu1 %977 }
 0x39f   : > { %v1038_v41 = vsel %vm1037_vm6, %v978_v58, 0.0 }
 0x3a0   : > { %v1044_v30 = vadd.f32 %v1042_v6, %v1038_v41 }
 0x3a6   : > { %v990_v44 = vpop.xlane.xlu1 %989 }
 0x3a7   : > { %v1046_v23 = vsel %vm1045_vm15, %v990_v44, 0.0 }
 0x3a8   : > { %v1048_v63 = vrot.slane %v1046_v23, 4 }
 0x3aa   : > { %v1050_v11 = vadd.f32 %v1048_v63, %v1044_v30 }
 0x3ae   : > { %v995_v10 = vpop.xlane.xlu1 %994 }
 0x3af   : > { %v1052_v61 = vsel %vm1051_vm7, %v995_v10, 0.0 }
 0x3b0   : > { %v1054_v5 = vrot.slane %v1052_v61, 4 }
 0x3b2   : > { %v1056_v40 = vadd.f32 %v1054_v5, %v1050_v11 }
 0x3b4   : > { %v1059_v56 = vadd.f32 %v1058_v3, %v1056_v40 }
 0x3b6   : > { %v1061_v12 = vsel %vm1060_vm9, %v1059_v56, 0.0 }
 0x3b7   : > { %1063 = vst [vmem:[%s192_s20] sm:$0x1] %v1061_v12 }
 0x3b8   : > { %1284 = shalt.err (!%p1281_p3)
}
 0x3b9   : > { %1171 = dma.vmem_to_hbm [thread:$0]  (%p1386_p5), %s1076_s24, 16, %s1078_s25, %s1065_s26  }
 0x3ba PF: > { %p1177_p4 = scmp.ge.s32.totalorder %s1319_s15, 2  ;;  %s1089_s6 = sand.u32 1, %s1307_s12  }
 0x3bb   : > { %s1090_s7 = scalar_lea.sflag [#allocation3], %s1089_s6 }
 0x3bc   : > { %p1174_p7 = pnand %p1177_p4, %p1390_p6 }
 0x3be   : > { %p1175_p8 = pneg %p1174_p7 }
 0x3c0   : > { %1302 = dma.done.wait (%p1175_p8), %s1090_s7, 16  }
 0x3c1   : > { %1304 = vsyncadd (%p1175_p8), %s1090_s7, 4294967280  ;;  %p13_p9 = scmp.ge.s32.totalorder %s1373_s18, 4   ;;  %s1903_s12 = smov %s1311_s13 }
 0x3c2   : > { %s1904_s13 = smov %s1315_s14  ;;  %s1905_s14 = smov %s1384_s21 }
 0x3c3   : > { %s1906_s15 = smov %s1373_s18  ;;  %15 = sbr.rel (!%p13_p9) target bundleno = 3 (0x3), region = 73 }
 0x3c8   :  { %1095 = vsyncpa [#allocation3], 1 }
 0x3c9   :  { %1097 = vsyncpa [#allocation3 + $0x1], 1 }

</bundles_post_ra>
